<compile_context>
chip_gen: v7x
topology: tpu7x:2x2x1
jax: 0.10.0
libtpu: 0.0.40
codegen_flags: <defaults>
</compile_context>

<pallas_src>
import jax
import jax.numpy as jnp
from jax.experimental import pallas as pl
from jax.experimental.pallas import tpu as pltpu


def mlp_kernel(x_ref, w1_ref, b1_ref, w2_ref, b2_ref, w3_ref, b3_ref, o_ref):
    # In-kernel bf16 cast of the f32 x tile (VPU work, hidden under the x DMA).
    x = x_ref[...].astype(jnp.bfloat16)
    # fc1 (bf16 in, f32 MXU accumulate) + bias + relu
    h1 = jnp.dot(x, w1_ref[...], preferred_element_type=jnp.float32)
    h1 = jnp.maximum(h1 + b1_ref[...], 0.0).astype(jnp.bfloat16)
    # fc2 + bias + relu (d2 zero-padded to 128 -> lane-dense, full MXU width)
    h2 = jnp.dot(h1, w2_ref[...], preferred_element_type=jnp.float32)
    h2 = jnp.maximum(h2 + b2_ref[...], 0.0).astype(jnp.bfloat16)
    # fc3 (zero-padded W3 rows contribute nothing) + bias
    logits = jnp.dot(h2, w3_ref[...], preferred_element_type=jnp.float32) + b3_ref[...]
    # numerically stable softmax over the class axis (dim=1); exact divide so
    # probabilities sum to 1 (the divide is free — the kernel is DMA-bound).
    m = jnp.max(logits, axis=1, keepdims=True)
    e = jnp.exp(logits - m)
    denom = jnp.sum(e, axis=1, keepdims=True)
    o_ref[...] = (e / denom).astype(o_ref.dtype)


def _pick_bm(B, *, min_bm=128, max_bm=1024, target_steps=4):
    """Batch tile: aim for ~target_steps grid steps (>=2 per TC on v7x megacore),
    clamped to [min_bm, max_bm]; tiny batches get a single minimal-pad step."""
    if B <= min_bm:
        return max(pl.cdiv(B, 8) * 8, 8)
    bm = (B // target_steps) // 128 * 128
    return max(min(bm, max_bm), min_bm)


def _vmem_limit(bm, d_in, d1, d2p, n_cls):
    """Scoped-VMEM request from actual buffer math (+50% headroom), not a constant."""
    x_buf = bm * d_in * 4                      # f32 x tile
    o_buf = bm * n_cls * 4                     # f32 output tile
    w_buf = (d_in * d1 + d1 * d2p + d2p * n_cls) * 2 + (d1 + d2p + n_cls) * 4
    act = bm * (d1 + d2p + n_cls) * 4          # live intermediates (h1/h2/logits)
    total = 2 * (x_buf + o_buf + w_buf) + act  # conservatively double-buffer all
    total = int(total * 1.5) + (2 << 20)
    return int(min(max(total, 16 << 20), 64 << 20))


def mlp_forward(x, w1, b1, w2, b2, w3, b3, *, bm=None):
    B, d_in = x.shape
    d1 = w1.shape[1]
    d2 = w2.shape[1]
    n_cls = w3.shape[1]

    d2p = pl.cdiv(d2, 128) * 128   # 64 -> 128 (lane-dense hidden)
    if bm is None:
        bm = _pick_bm(B)
    b_pad = pl.cdiv(B, bm) * bm

    # x is fed in unpadded along K and un-cast (no extra HBM pass).  Batch pad
    # only when B % bm != 0 (a no-op for the common multiple-of-128 case).
    x_in = x if b_pad == B else jnp.pad(x, ((0, b_pad - B), (0, 0)))

    # Weight prep is tiny (<0.3 MiB total) and independent of B.
    w1_p = w1.astype(jnp.bfloat16)                                      # (784, 128)
    b1_p = b1.reshape(1, d1).astype(jnp.float32)
    w2_p = jnp.pad(w2, ((0, 0), (0, d2p - d2))).astype(jnp.bfloat16)    # (128, 128)
    b2_p = jnp.pad(b2.reshape(1, d2), ((0, 0), (0, d2p - d2))).astype(jnp.float32)
    w3_p = jnp.pad(w3, ((0, d2p - d2), (0, 0))).astype(jnp.bfloat16)    # (128, 10)
    b3_p = b3.reshape(1, n_cls).astype(jnp.float32)

    grid = (b_pad // bm,)
    out = pl.pallas_call(
        mlp_kernel,
        out_shape=jax.ShapeDtypeStruct((b_pad, n_cls), jnp.float32),
        grid_spec=pltpu.PrefetchScalarGridSpec(
            num_scalar_prefetch=0,
            grid=grid,
            in_specs=[
                # x tile: f32, full-extent K (784 == full array dim, legal block).
                pl.BlockSpec((bm, d_in), lambda i: (i, 0)),
                # Weights/biases: constant index_map -> VMEM-resident, no re-DMA.
                pl.BlockSpec((d_in, d1), lambda i: (0, 0)),    # W1 (784,128) bf16
                pl.BlockSpec((1, d1), lambda i: (0, 0)),       # b1 (1,128) f32
                pl.BlockSpec((d1, d2p), lambda i: (0, 0)),     # W2 (128,128) bf16
                pl.BlockSpec((1, d2p), lambda i: (0, 0)),      # b2 (1,128) f32
                pl.BlockSpec((d2p, n_cls), lambda i: (0, 0)),  # W3 (128,10) bf16
                pl.BlockSpec((1, n_cls), lambda i: (0, 0)),    # b3 (1,10) f32
            ],
            # Output written directly at its true width (10 == full array dim):
            # no padded 128-lane writeback and no wrapper slice pass.
            out_specs=pl.BlockSpec((bm, n_cls), lambda i: (i, 0)),
        ),
        compiler_params=pltpu.CompilerParams(
            dimension_semantics=("parallel",),  # batch tiles shard across TCs
            vmem_limit_bytes=_vmem_limit(bm, d_in, d1, d2p, n_cls),
        ),
    )(x_in, w1_p, b1_p, w2_p, b2_p, w3_p, b3_p)
    return out if b_pad == B else out[:B]


def _init_linear(key, fan_in, fan_out):
    # Deterministic init mimicking PyTorch nn.Linear defaults:
    # weight ~ U(-1/sqrt(fan_in), 1/sqrt(fan_in)), bias same bound.
    kw, kb = jax.random.split(key)
    bound = 1.0 / jnp.sqrt(float(fan_in))
    w = jax.random.uniform(kw, (fan_in, fan_out), jnp.float32, -bound, bound)
    b = jax.random.uniform(kb, (1, fan_out), jnp.float32, -bound, bound)
    return w, b


if __name__ == "__main__":
    key = jax.random.PRNGKey(0)
    kx, k1, k2, k3 = jax.random.split(key, 4)

    # B=512 -> bm=128 -> 4 grid steps (>=2 per TensorCore on v7x megacore).
    B = 512
    x = jax.random.normal(kx, (B, 784), jnp.float32)

    w1, b1 = _init_linear(k1, 784, 128)
    w2, b2 = _init_linear(k2, 128, 64)
    w3, b3 = _init_linear(k3, 64, 10)

    out = mlp_forward(x, w1, b1, w2, b2, w3, b3)
    out = jax.block_until_ready(out)
    assert out.shape == (B, 10)

    # Reference 1: bf16-matched math (same casts as the kernel) -> tight check.
    xb = x.astype(jnp.bfloat16)
    w1b, w2b, w3b = (w.astype(jnp.bfloat16) for w in (w1, w2, w3))
    h1 = jnp.maximum(jnp.dot(xb, w1b, preferred_element_type=jnp.float32) + b1, 0.0)
    h1 = h1.astype(jnp.bfloat16)
    h2 = jnp.maximum(jnp.dot(h1, w2b, preferred_element_type=jnp.float32) + b2, 0.0)
    h2 = h2.astype(jnp.bfloat16)
    logits = jnp.dot(h2, w3b, preferred_element_type=jnp.float32) + b3
    ref_bf16 = jax.nn.softmax(logits, axis=1)
    assert jnp.allclose(out, ref_bf16, atol=2e-3, rtol=1e-2), "mismatch vs bf16 reference"

    # Reference 2: full f32 math (the PyTorch module's semantics) -> loose sanity.
    h1f = jnp.maximum(x @ w1 + b1, 0.0)
    h2f = jnp.maximum(h1f @ w2 + b2, 0.0)
    ref_f32 = jax.nn.softmax(h2f @ w3 + b3, axis=1)
    assert jnp.allclose(out, ref_f32, atol=3e-2), "mismatch vs f32 reference"

    # Exact softmax divide -> probabilities sum to 1 within f32 rounding.
    assert jnp.allclose(jnp.sum(out, axis=1), 1.0, atol=1e-4)

    print("KERNEL_OK")
</pallas_src>

<mosaic_0001>
module attributes {stable_mosaic.version = 11 : i64} {
  func.func @mlp_kernel(%arg0: i32, %arg1: memref<128x784xf32, #tpu.memory_space<vmem>>, %arg2: memref<784x128xbf16, #tpu.memory_space<vmem>>, %arg3: memref<1x128xf32, #tpu.memory_space<vmem>>, %arg4: memref<128x128xbf16, #tpu.memory_space<vmem>>, %arg5: memref<1x128xf32, #tpu.memory_space<vmem>>, %arg6: memref<128x10xbf16, #tpu.memory_space<vmem>>, %arg7: memref<1x10xf32, #tpu.memory_space<vmem>>, %arg8: memref<128x10xf32, #tpu.memory_space<vmem>>) attributes {dimension_semantics = [#tpu.dimension_semantics<parallel>], iteration_bounds = array<i64: 4>, scalar_prefetch = 0 : i64, scratch_operands = 0 : i64, tpu.core_type = #tpu.core_type<tc>, window_params = [{transform_indices = @transform_0, window_bounds = array<i64: 128, 784>}, {pipeline_mode = #tpu.pipeline_mode<synchronous>, transform_indices = @transform_1, window_bounds = array<i64: 784, 128>}, {pipeline_mode = #tpu.pipeline_mode<synchronous>, transform_indices = @transform_2, window_bounds = array<i64: 1, 128>}, {pipeline_mode = #tpu.pipeline_mode<synchronous>, transform_indices = @transform_3, window_bounds = array<i64: 128, 128>}, {pipeline_mode = #tpu.pipeline_mode<synchronous>, transform_indices = @transform_4, window_bounds = array<i64: 1, 128>}, {pipeline_mode = #tpu.pipeline_mode<synchronous>, transform_indices = @transform_5, window_bounds = array<i64: 128, 10>}, {pipeline_mode = #tpu.pipeline_mode<synchronous>, transform_indices = @transform_6, window_bounds = array<i64: 1, 10>}, {transform_indices = @transform_7, window_bounds = array<i64: 128, 10>}]} {
    %c0 = arith.constant 0 : index
    %c0_0 = arith.constant 0 : index
    %0 = vector.load %arg1[%c0, %c0_0] : memref<128x784xf32, #tpu.memory_space<vmem>>, vector<128x784xf32>
    %1 = arith.truncf %0 : vector<128x784xf32> to vector<128x784xbf16>
    %c0_1 = arith.constant 0 : index
    %c0_2 = arith.constant 0 : index
    %2 = vector.load %arg2[%c0_1, %c0_2] : memref<784x128xbf16, #tpu.memory_space<vmem>>, vector<784x128xbf16>
    %cst = arith.constant dense<0.000000e+00> : vector<128x128xf32>
    %3 = tpu.matmul %1, %2, %cst {dimension_numbers = #tpu.dot_dimension_numbers<[1], [0], [0], [1], [0, 0, 1, 1], [], []>} : vector<128x784xbf16>, vector<784x128xbf16>, vector<128x128xf32> -> vector<128x128xf32>
    %c0_3 = arith.constant 0 : index
    %c0_4 = arith.constant 0 : index
    %4 = vector.load %arg3[%c0_3, %c0_4] : memref<1x128xf32, #tpu.memory_space<vmem>>, vector<1x128xf32>
    %5 = vector.broadcast %4 : vector<1x128xf32> to vector<128x128xf32>
    %6 = arith.addf %3, %5 : vector<128x128xf32>
    %cst_5 = arith.constant 0.000000e+00 : f32
    %7 = vector.broadcast %cst_5 : f32 to vector<128x128xf32>
    %8 = arith.maximumf %6, %7 : vector<128x128xf32>
    %9 = arith.truncf %8 : vector<128x128xf32> to vector<128x128xbf16>
    %c0_6 = arith.constant 0 : index
    %c0_7 = arith.constant 0 : index
    %10 = vector.load %arg4[%c0_6, %c0_7] : memref<128x128xbf16, #tpu.memory_space<vmem>>, vector<128x128xbf16>
    %cst_8 = arith.constant dense<0.000000e+00> : vector<128x128xf32>
    %11 = tpu.matmul %9, %10, %cst_8 {dimension_numbers = #tpu.dot_dimension_numbers<[1], [0], [0], [1], [0, 0, 1, 1], [], []>} : vector<128x128xbf16>, vector<128x128xbf16>, vector<128x128xf32> -> vector<128x128xf32>
    %c0_9 = arith.constant 0 : index
    %c0_10 = arith.constant 0 : index
    %12 = vector.load %arg5[%c0_9, %c0_10] : memref<1x128xf32, #tpu.memory_space<vmem>>, vector<1x128xf32>
    %13 = vector.broadcast %12 : vector<1x128xf32> to vector<128x128xf32>
    %14 = arith.addf %11, %13 : vector<128x128xf32>
    %cst_11 = arith.constant 0.000000e+00 : f32
    %15 = vector.broadcast %cst_11 : f32 to vector<128x128xf32>
    %16 = arith.maximumf %14, %15 : vector<128x128xf32>
    %17 = arith.truncf %16 : vector<128x128xf32> to vector<128x128xbf16>
    %c0_12 = arith.constant 0 : index
    %c0_13 = arith.constant 0 : index
    %18 = vector.load %arg6[%c0_12, %c0_13] : memref<128x10xbf16, #tpu.memory_space<vmem>>, vector<128x10xbf16>
    %cst_14 = arith.constant dense<0.000000e+00> : vector<128x10xf32>
    %19 = tpu.matmul %17, %18, %cst_14 {dimension_numbers = #tpu.dot_dimension_numbers<[1], [0], [0], [1], [0, 0, 1, 1], [], []>} : vector<128x128xbf16>, vector<128x10xbf16>, vector<128x10xf32> -> vector<128x10xf32>
    %c0_15 = arith.constant 0 : index
    %c0_16 = arith.constant 0 : index
    %20 = vector.load %arg7[%c0_15, %c0_16] : memref<1x10xf32, #tpu.memory_space<vmem>>, vector<1x10xf32>
    %21 = vector.broadcast %20 : vector<1x10xf32> to vector<128x10xf32>
    %22 = arith.addf %19, %21 : vector<128x10xf32>
    %cst_17 = arith.constant dense<0xFF800000> : vector<128xf32>
    %23 = vector.multi_reduction <maximumf>, %22, %cst_17 [1] : vector<128x10xf32> to vector<128xf32>
    %24 = vector.shape_cast %23 : vector<128xf32> to vector<128x1xf32>
    %25 = vector.broadcast %24 : vector<128x1xf32> to vector<128x10xf32>
    %26 = arith.subf %22, %25 : vector<128x10xf32>
    %27 = math.exp %26 : vector<128x10xf32>
    %cst_18 = arith.constant dense<0.000000e+00> : vector<128xf32>
    %28 = vector.multi_reduction <add>, %27, %cst_18 [1] : vector<128x10xf32> to vector<128xf32>
    %29 = vector.shape_cast %28 : vector<128xf32> to vector<128x1xf32>
    %30 = vector.broadcast %29 : vector<128x1xf32> to vector<128x10xf32>
    %31 = arith.divf %27, %30 : vector<128x10xf32>
    %c0_19 = arith.constant 0 : index
    %c0_20 = arith.constant 0 : index
    %32 = vector.load %arg8[%c0_19, %c0_20] : memref<128x10xf32, #tpu.memory_space<vmem>>, vector<128x10xf32>
    tpu.vector_store %arg8[%c0_19, %c0_20], %31 {strides = array<i32>} : memref<128x10xf32, #tpu.memory_space<vmem>>, vector<128x10xf32>,
    return
  }
  func.func @transform_0(%arg0: i32) -> (i32, i32) {
    %c0_i32 = arith.constant 0 : i32
    %c0_i32_0 = arith.constant 0 : i32
    return %arg0, %c0_i32 : i32, i32
  }
  func.func @transform_1(%arg0: i32) -> (i32, i32) {
    %c0_i32 = arith.constant 0 : i32
    %c0_i32_0 = arith.constant 0 : i32
    %c0_i32_1 = arith.constant 0 : i32
    return %c0_i32, %c0_i32_0 : i32, i32
  }
  func.func @transform_2(%arg0: i32) -> (i32, i32) {
    %c0_i32 = arith.constant 0 : i32
    %c0_i32_0 = arith.constant 0 : i32
    %c0_i32_1 = arith.constant 0 : i32
    return %c0_i32, %c0_i32_0 : i32, i32
  }
  func.func @transform_3(%arg0: i32) -> (i32, i32) {
    %c0_i32 = arith.constant 0 : i32
    %c0_i32_0 = arith.constant 0 : i32
    %c0_i32_1 = arith.constant 0 : i32
    return %c0_i32, %c0_i32_0 : i32, i32
  }
  func.func @transform_4(%arg0: i32) -> (i32, i32) {
    %c0_i32 = arith.constant 0 : i32
    %c0_i32_0 = arith.constant 0 : i32
    %c0_i32_1 = arith.constant 0 : i32
    return %c0_i32, %c0_i32_0 : i32, i32
  }
  func.func @transform_5(%arg0: i32) -> (i32, i32) {
    %c0_i32 = arith.constant 0 : i32
    %c0_i32_0 = arith.constant 0 : i32
    %c0_i32_1 = arith.constant 0 : i32
    return %c0_i32, %c0_i32_0 : i32, i32
  }
  func.func @transform_6(%arg0: i32) -> (i32, i32) {
    %c0_i32 = arith.constant 0 : i32
    %c0_i32_0 = arith.constant 0 : i32
    %c0_i32_1 = arith.constant 0 : i32
    return %c0_i32, %c0_i32_0 : i32, i32
  }
  func.func @transform_7(%arg0: i32) -> (i32, i32) {
    %c0_i32 = arith.constant 0 : i32
    %c0_i32_0 = arith.constant 0 : i32
    return %arg0, %c0_i32 : i32, i32
  }
}

</mosaic_0001>

<bundles_post_ra>
// kernel: tpu_custom_call.1
= control target key start
LH: loop header
LB: loop body
LE: loop exit
PB: predicated region body
PF: predicated region fallthrough
CT: control target
= control target key end

     0   :  { %s2503_s24 = smov 0   ;;  %s3112_s0 = inlined_call_operand.vmem [shape: f32[512,784], index: 0, kind: input, shape index: {}]   ;;  %s3113_s1 = inlined_call_operand.vmem [shape: bf16[784,128], index: 1, kind: input, shape index: {}]   ;;  %s3114_s2 = inlined_call_operand.vmem [shape: f32[1,128], index: 2, kind: input, shape index: {}]   ;;  %s3115_s3 = inlined_call_operand.vmem [shape: bf16[128,128], index: 3, kind: input, shape index: {}]   ;;  %s3116_s4 = inlined_call_operand.vmem [shape: f32[1,128], index: 4, kind: input, shape index: {}]   ;;  %s3117_s5 = inlined_call_operand.vmem [shape: bf16[128,10], index: 5, kind: input, shape index: {}]   ;;  %s3118_s6 = inlined_call_operand.vmem [shape: f32[1,10], index: 6, kind: input, shape index: {}]   ;;  %s3119_s7 = inlined_call_operand.vmem [shape: f32[512,10], index: 7, kind: output, shape index: {}]  }
   0x1 LB: > { %s1899_s25 = sadd.s32 4294967295, %s2461_s24   ;;  %p1903_p0 = scmp.ge.s32.totalorder %s2461_s24, 1  ;;  %s2461_s24 = sphi %s2503_s24, %s17_s24  }
   0x2   : > { %p239_p1 = scmp.lt.s32.totalorder %s2461_s24, 5 }
   0x4   : > { %p240_p2 = pnand %p1903_p0, %p239_p1 }
   0x5   : > { %v2326_v0 = vld [vmem:[%s3113_s1 + $0x40] sm:$0xff] (!%p240_p2)   ;;  %v2330_v4 = vld [vmem:[%s3113_s1 + $0x48] sm:$0xff] (!%p240_p2)   ;;  %v2334_v8 = vld [vmem:[%s3113_s1 + $0x50] sm:$0xff] (!%p240_p2)   ;;  %s1904_s12 = sshll.u32 (!%p240_p2), %s1899_s25, 4  ;;  %vm853_vm0 = vcmask (!%p240_p2), 130048   ;;  %vm1650_vm1 = vcmask (!%p240_p2), 80896  }
   0x6   : > { %243 = sbr.rel (%p240_p2) target bundleno = 1134 (0x46e), region = 48  ;;  %v2327_v1 = vld [vmem:[%s3113_s1 + $0xc0] sm:$0xff] (!%p240_p2)   ;;  %1986 = vmatprep.subr.bf16.mxu0 (!%p240_p2), %v2326_v0  ;;  %v2331_v5 = vld [vmem:[%s3113_s1 + $0xc8] sm:$0xff] (!%p240_p2)   ;;  %v2335_v9 = vld [vmem:[%s3113_s1 + $0xd0] sm:$0xff] (!%p240_p2)   ;;  %p273_p3 = scmp.lt.s32.totalorder (!%p240_p2), %s1904_s12, 63 }
   0x7   : > { %v2328_v2 = vld [vmem:[%s3113_s1] sm:$0xff] (!%p240_p2)   ;;  %2050 = vmatprep.subr.bf16.mxu1 (!%p240_p2), %v2327_v1  ;;  %v2332_v6 = vld [vmem:[%s3113_s1 + $0x8] sm:$0xff] (!%p240_p2)   ;;  %v2336_v10 = vld [vmem:[%s3113_s1 + $0x10] sm:$0xff] (!%p240_p2)  }
   0x8   : > { %v2329_v3 = vld [vmem:[%s3113_s1 + $0x80] sm:$0xff] (!%p240_p2)   ;;  %1987 = vmatpush3.bf16.msra.mxu0 (!%p240_p2), %v2328_v2  ;;  %v2333_v7 = vld [vmem:[%s3113_s1 + $0x88] sm:$0xff] (!%p240_p2)   ;;  %v2337_v11 = vld [vmem:[%s3113_s1 + $0x90] sm:$0xff] (!%p240_p2)  }
   0x9   : > { %2051 = vmatpush3.bf16.msra.mxu1 (!%p240_p2), %v2329_v3  ;;  %1988 = vmatprep.subr.bf16.mxu0 (!%p240_p2), %v2330_v4  ;;  %v2338_v12 = vld [vmem:[%s3113_s1 + $0x58] sm:$0xff] (!%p240_p2)   ;;  %v2342_v16 = vld [vmem:[%s3113_s1 + $0x60] sm:$0xff] (!%p240_p2)   ;;  %v2346_v20 = vld [vmem:[%s3113_s1 + $0x68] sm:$0xff] (!%p240_p2)  }
   0xa   : > { %2052 = vmatprep.subr.bf16.mxu1 (!%p240_p2), %v2331_v5  ;;  %v2339_v13 = vld [vmem:[%s3113_s1 + $0xd8] sm:$0xff] (!%p240_p2)   ;;  %v2343_v17 = vld [vmem:[%s3113_s1 + $0xe0] sm:$0xff] (!%p240_p2)   ;;  %v2347_v21 = vld [vmem:[%s3113_s1 + $0xe8] sm:$0xff] (!%p240_p2)  }
   0xb   : > { %v2340_v14 = vld [vmem:[%s3113_s1 + $0x18] sm:$0xff] (!%p240_p2)   ;;  %v2344_v18 = vld [vmem:[%s3113_s1 + $0x20] sm:$0xff] (!%p240_p2)   ;;  %v2348_v22 = vld [vmem:[%s3113_s1 + $0x28] sm:$0xff] (!%p240_p2)  }
   0xc   : > { %1989 = vmatpush3.bf16.msra.mxu0 (!%p240_p2), %v2332_v6  ;;  %v2341_v15 = vld [vmem:[%s3113_s1 + $0x98] sm:$0xff] (!%p240_p2)   ;;  %v2345_v19 = vld [vmem:[%s3113_s1 + $0xa0] sm:$0xff] (!%p240_p2)   ;;  %v2349_v23 = vld [vmem:[%s3113_s1 + $0xa8] sm:$0xff] (!%p240_p2)  }
   0xd   : > { %2053 = vmatpush3.bf16.msra.mxu1 %v2333_v7  ;;  %1990 = vmatprep.subr.bf16.mxu0 %v2334_v8  ;;  %s3121_s12 = smov (!%p273_p3, %s1904_s12), 63  ;;  %v2350_v24 = vld [vmem:[%s3113_s1 + $0x70] sm:$0xff]   ;;  %v2354_v28 = vld [vmem:[%s3113_s1 + $0x78] sm:$0xff]   ;;  %v2358_v44 = vld [vmem:[%s3113_s1 + $0x140] sm:$0xff]  }
   0xe   : > { %2054 = vmatprep.subr.bf16.mxu1 %v2335_v9  ;;  %v2351_v25 = vld [vmem:[%s3113_s1 + $0xf0] sm:$0xff]   ;;  %s2317_s14 = smul.u32 56, %s3121_s12  ;;  %v2355_v29 = vld [vmem:[%s3113_s1 + $0xf8] sm:$0xff]   ;;  %v2359_v45 = vld [vmem:[%s3113_s1 + $0x100] sm:$0xff]   ;;  %s1907_s19 = sshll.u32 %s3121_s12, 3 }
   0xf   : > { %v2352_v26 = vld [vmem:[%s3113_s1 + $0x30] sm:$0xff]   ;;  %v2356_v30 = vld [vmem:[%s3113_s1 + $0x38] sm:$0xff]   ;;  %v2360_v57 = vld [vmem:[%s3113_s1 + $0x148] sm:$0xff]   ;;  %s3059_s21 = scalar_lea.vmem %s3119_s7, %s1907_s19 }
  0x10   : > { %1991 = vmatpush3.bf16.msra.mxu0 %v2336_v10  ;;  %v2353_v27 = vld [vmem:[%s3113_s1 + $0xb0] sm:$0xff]   ;;  %s2609_s26 = scalar_lea.vmem %s3112_s0, %s2317_s14  ;;  %v2357_v31 = vld [vmem:[%s3113_s1 + $0xb8] sm:$0xff]   ;;  %v2361_v59 = vld [vmem:[%s3113_s1 + $0x108] sm:$0xff]  }
  0x11   : > { %2055 = vmatpush3.bf16.msra.mxu1 %v2337_v11  ;;  %1992 = vmatprep.subr.bf16.mxu0 %v2338_v12  ;;  %v287_v32 = vld [vmem:[%s2609_s26 + $0x8] sm:$0xff]  ;;  %v294_v33 = vld [vmem:[%s2609_s26 + $0x40] sm:$0xff]  ;;  %v289_v34 = vld [vmem:[%s2609_s26 + $0x18] sm:$0xff] }
  0x12   : > { %2056 = vmatprep.subr.bf16.mxu1 %v2339_v13  ;;  %v399_v35 = vpack.c.bf16 %v294_v33, %v287_v32  ;;  %v296_v36 = vld [vmem:[%s2609_s26 + $0x50] sm:$0xff]  ;;  %v286_v37 = vld [vmem:[%s2609_s26] sm:$0xff]  ;;  %v293_v38 = vld [vmem:[%s2609_s26 + $0x38] sm:$0xff] }
  0x13   : > { %v401_v39 = vpack.c.bf16 %v296_v36, %v289_v34  ;;  %v398_v40 = vpack.c.bf16 %v293_v38, %v286_v37  ;;  %v288_v41 = vld [vmem:[%s2609_s26 + $0x10] sm:$0xff]  ;;  %v295_v42 = vld [vmem:[%s2609_s26 + $0x48] sm:$0xff]  ;;  %v301_v46 = vld [vmem:[%s2609_s26 + $0x78] sm:$0xff] }
  0x14   : > { %1993 = vmatpush3.bf16.msra.mxu0 %v2340_v14  ;;  %910 = vmatprep.mubr.bf16.mxu0 %v399_v35  ;;  %v400_v43 = vpack.c.bf16 %v295_v42, %v288_v41  ;;  %v308_v47 = vld [vmem:[%s2609_s26 + $0xb0] sm:$0xff]  ;;  %v303_v48 = vld [vmem:[%s2609_s26 + $0x88] sm:$0xff]  ;;  %v310_v49 = vld [vmem:[%s2609_s26 + $0xc0] sm:$0xff] }
  0x15   : > { %2057 = vmatpush3.bf16.msra.mxu1 %v2341_v15  ;;  %1994 = vmatprep.subr.bf16.mxu0 %v2342_v16  ;;  %v406_v50 = vpack.c.bf16 %v308_v47, %v301_v46  ;;  %v408_v51 = vpack.c.bf16 %v310_v49, %v303_v48  ;;  %v300_v52 = vld [vmem:[%s2609_s26 + $0x70] sm:$0xff]  ;;  %v307_v53 = vld [vmem:[%s2609_s26 + $0xa8] sm:$0xff]  ;;  %v302_v54 = vld [vmem:[%s2609_s26 + $0x80] sm:$0xff] }
  0x16   : > { %2058 = vmatprep.subr.bf16.mxu1 %v2343_v17  ;;  %1007 = vmatprep.mubr.bf16.mxu1 %v401_v39  ;;  %v309_v55 = vld [vmem:[%s2609_s26 + $0xb8] sm:$0xff]  ;;  %v405_v56 = vpack.c.bf16 %v307_v53, %v300_v52  ;;  %v315_v60 = vld [vmem:[%s2609_s26 + $0xe8] sm:$0xff]  ;;  %v322_v61 = vld [vmem:[%s2609_s26 + $0x120] sm:$0xff] }
  0x17   : > { %v407_v58 = vpack.c.bf16 %v309_v55, %v302_v54  ;;  %v413_v62 = vpack.c.bf16 %v322_v61, %v315_v60  ;;  %v317_v63 = vld [vmem:[%s2609_s26 + $0xf8] sm:$0xff]  ;;  %v324_v0 = vld [vmem:[%s2609_s26 + $0x130] sm:$0xff]  ;;  %v314_v2 = vld [vmem:[%s2609_s26 + $0xe0] sm:$0xff] }
  0x18   : > { %1995 = vmatpush3.bf16.msra.mxu0 %v2344_v18  ;;  %v415_v1 = vpack.c.bf16 %v324_v0, %v317_v63  ;;  %v321_v3 = vld [vmem:[%s2609_s26 + $0x118] sm:$0xff]  ;;  %v316_v4 = vld [vmem:[%s2609_s26 + $0xf0] sm:$0xff]  ;;  %v323_v7 = vld [vmem:[%s2609_s26 + $0x128] sm:$0xff] }
  0x19   : > { %2059 = vmatpush3.bf16.msra.mxu1 %v2345_v19  ;;  %1996 = vmatprep.subr.bf16.mxu0 %v2346_v20  ;;  %v2362_v5 = vld [vmem:[%s3113_s1 + $0x150] sm:$0xff]   ;;  %v329_v8 = vld [vmem:[%s2609_s26 + $0x158] sm:$0xff]  ;;  %v331_v10 = vld [vmem:[%s2609_s26 + $0x168] sm:$0xff]  ;;  %v412_v12 = vpack.c.bf16 %v321_v3, %v314_v2  ;;  %v414_v13 = vpack.c.bf16 %v323_v7, %v316_v4 }
  0x1a   : > { %2060 = vmatprep.subr.bf16.mxu1 %v2347_v21  ;;  %v2363_v6 = vld [vmem:[%s3113_s1 + $0x110] sm:$0xff]   ;;  %v338_v11 = vld [vmem:[%s2609_s26 + $0x1a0] sm:$0xff]  ;;  %v2364_v15 = vld [vmem:[%s3113_s1 + $0x158] sm:$0xff]  }
  0x1b   : > { %v336_v9 = vld [vmem:[%s2609_s26 + $0x190] sm:$0xff]  ;;  %v422_v16 = vpack.c.bf16 %v338_v11, %v331_v10  ;;  %v2365_v17 = vld [vmem:[%s3113_s1 + $0x118] sm:$0xff]   ;;  %v335_v19 = vld [vmem:[%s2609_s26 + $0x188] sm:$0xff] }
  0x1c   : > { %1997 = vmatpush3.bf16.msra.mxu0 %v2348_v22  ;;  %v420_v14 = vpack.c.bf16 %v336_v9, %v329_v8  ;;  %v328_v18 = vld [vmem:[%s2609_s26 + $0x150] sm:$0xff]  ;;  %v330_v20 = vld [vmem:[%s2609_s26 + $0x160] sm:$0xff]  ;;  %v337_v21 = vld [vmem:[%s2609_s26 + $0x198] sm:$0xff] }
  0x1d   : > { %2061 = vmatpush3.bf16.msra.mxu1 %v2349_v23  ;;  %1998 = vmatprep.subr.bf16.mxu0 %v2350_v24  ;;  %v343_v22 = vld [vmem:[%s2609_s26 + $0x1c8] sm:$0xff]  ;;  %v350_v23 = vld [vmem:[%s2609_s26 + $0x200] sm:$0xff]  ;;  %v349_v35 = vld [vmem:[%s2609_s26 + $0x1f8] sm:$0xff] }
  0x1e   : > { %2062 = vmatprep.subr.bf16.mxu1 %v2351_v25  ;;  %v2366_v24 = vld [vmem:[%s3113_s1 + $0x160] sm:$0xff]   ;;  %v345_v25 = vld [vmem:[%s2609_s26 + $0x1d8] sm:$0xff]  ;;  %v2368_v32 = vld [vmem:[%s3113_s1 + $0x168] sm:$0xff]  }
  0x1f   : > { %v2369_v33 = vld [vmem:[%s3113_s1 + $0x128] sm:$0xff]   ;;  %v342_v34 = vld [vmem:[%s2609_s26 + $0x1c0] sm:$0xff]  ;;  %v344_v36 = vld [vmem:[%s2609_s26 + $0x1d0] sm:$0xff] }
  0x20   : > { %1999 = vmatpush3.bf16.msra.mxu0 %v2352_v26  ;;  %v352_v26 = vld [vmem:[%s2609_s26 + $0x210] sm:$0xff]  ;;  %v351_v37 = vld [vmem:[%s2609_s26 + $0x208] sm:$0xff]  ;;  %v357_v38 = vld [vmem:[%s2609_s26 + $0x238] sm:$0xff] }
  0x21   : > { %2063 = vmatpush3.bf16.msra.mxu1 %v2353_v27  ;;  %2000 = vmatprep.subr.bf16.mxu0 %v2354_v28  ;;  %v2367_v27 = vld [vmem:[%s3113_s1 + $0x120] sm:$0xff]   ;;  %v419_v28 = vpack.c.bf16 %v335_v19, %v328_v18  ;;  %v364_v39 = vld [vmem:[%s2609_s26 + $0x270] sm:$0xff]  ;;  %v2372_v49 = vld [vmem:[%s3113_s1 + $0x178] sm:$0xff]  }
  0x22   : > { %2064 = vmatprep.subr.bf16.mxu1 %v2355_v29  ;;  %v421_v29 = vpack.c.bf16 %v337_v21, %v330_v20  ;;  %v366_v41 = vld [vmem:[%s2609_s26 + $0x280] sm:$0xff]  ;;  %v2370_v42 = vld [vmem:[%s3113_s1 + $0x170] sm:$0xff]   ;;  %v434_v46 = vpack.c.bf16 %v364_v39, %v357_v38  ;;  %v2373_v52 = vld [vmem:[%s3113_s1 + $0x138] sm:$0xff]  }
  0x23   : > { %v356_v48 = vld [vmem:[%s2609_s26 + $0x230] sm:$0xff]  ;;  %v365_v53 = vld [vmem:[%s2609_s26 + $0x278] sm:$0xff]  ;;  %v371_v54 = vld [vmem:[%s2609_s26 + $0x2a8] sm:$0xff] }
  0x24   : > { %2001 = vmatpush3.bf16.msra.mxu0 %v2356_v30  ;;  %v427_v30 = vpack.c.bf16 %v350_v23, %v343_v22  ;;  %v378_v55 = vld [vmem:[%s2609_s26 + $0x2e0] sm:$0xff]  ;;  %v377_v0 = vld [vmem:[%s2609_s26 + $0x2d8] sm:$0xff]  ;;  %v379_v2 = vld [vmem:[%s2609_s26 + $0x2e8] sm:$0xff] }
  0x25   : > { %2065 = vmatpush3.bf16.msra.mxu1 %v2357_v31  ;;  %2114 = vmatprep.subr.bf16.mxu0 %v2358_v44  ;;  %v429_v31 = vpack.c.bf16 %v352_v26, %v345_v25  ;;  %v441_v60 = vpack.c.bf16 %v378_v55, %v371_v54  ;;  %v370_v63 = vld [vmem:[%s2609_s26 + $0x2a0] sm:$0xff]  ;;  %v385_v3 = vld [vmem:[%s2609_s26 + $0x318] sm:$0xff]  ;;  %v392_v4 = vld [vmem:[%s2609_s26 + $0x350] sm:$0xff] }
  0x26   : > { %2301 = vmatprep.subr.bf16.mxu1 %v2358_v44  ;;  %v2371_v44 = vld [vmem:[%s3113_s1 + $0x130] sm:$0xff]   ;;  %v440_v7 = vpack.c.bf16 %v377_v0, %v370_v63  ;;  %v448_v9 = vpack.c.bf16 %v392_v4, %v385_v3  ;;  %v382_v18 = vld [vmem:[%s2609_s26 + $0x300] sm:$0xff]  ;;  %v381_v26 = vld [vmem:[%s2609_s26 + $0x2f8] sm:$0xff] }
  0x27   : > { %911 = vmatmul.mubr.bf16.vlgmr.msra.gmra.mrb[0].mxu0 %v398_v40  ;;  %v359_v40 = vld [vmem:[%s2609_s26 + $0x248] sm:$0xff]  ;;  %v384_v11 = vld [vmem:[%s2609_s26 + $0x310] sm:$0xff]  ;;  %v290_v23 = vld [vmem:[%s2609_s26 + $0x20] sm:$0xff] }
  0x28   : > { %1008 = vmatmul.mubr.bf16.vlgmr.msra.gmra.mrb[0].mxu1 %v400_v43  ;;  %2115 = vmatpush3.bf16.msra.mxu0 %v2359_v45  ;;  %v426_v43 = vpack.c.bf16 %v349_v35, %v342_v34  ;;  %v436_v47 = vpack.c.bf16 %v366_v41, %v359_v40  ;;  %v374_v25 = vld [vmem:[%s2609_s26 + $0x2c0] sm:$0xff]  ;;  %v304_v35 = vld [vmem:[%s2609_s26 + $0x90] sm:$0xff]  ;;  %v395_v38 = vld [vmem:[%s2609_s26 + $0x368] sm:$0xff] }
  0x29   : > { %2309 = vmatpush3.bf16.msra.mxu1 %v2359_v45  ;;  %918 = vmatprep.mubr.bf16.mxu0 %v406_v50  ;;  %v428_v45 = vpack.c.bf16 %v351_v37, %v344_v36  ;;  %v363_v50 = vld [vmem:[%s2609_s26 + $0x268] sm:$0xff]  ;;  %v388_v37 = vld [vmem:[%s2609_s26 + $0x330] sm:$0xff]  ;;  %v326_v40 = vld [vmem:[%s2609_s26 + $0x140] sm:$0xff] }
  0x2a   : > { %1015 = vmatprep.mubr.bf16.mxu1 %v408_v51  ;;  %2116 = vmatprep.subr.bf16.mxu0 %v2360_v57  ;;  %v358_v51 = vld [vmem:[%s2609_s26 + $0x240] sm:$0xff]  ;;  %v311_v36 = vld [vmem:[%s2609_s26 + $0xc8] sm:$0xff]  ;;  %v292_v41 = vld [vmem:[%s2609_s26 + $0x30] sm:$0xff] }
  0x2b   : > { %2302 = vmatprep.subr.bf16.mxu1 %v2360_v57  ;;  %v380_v57 = vld [vmem:[%s2609_s26 + $0x2f0] sm:$0xff]  ;;  %v319_v39 = vld [vmem:[%s2609_s26 + $0x108] sm:$0xff]  ;;  %v354_v0 = vld [vmem:[%s2609_s26 + $0x220] sm:$0xff] }
  0x2c   : > { %2117 = vmatpush3.bf16.msra.mxu0 %v2361_v59  ;;  %v327_v54 = vld [vmem:[%s2609_s26 + $0x148] sm:$0xff] }
  0x2d   : > { %2310 = vmatpush3.bf16.msra.mxu1 %v2361_v59  ;;  %2118 = vmatprep.subr.bf16.mxu0 %v2362_v5  ;;  %v435_v59 = vpack.c.bf16 %v365_v53, %v358_v51  ;;  %v333_v51 = vld [vmem:[%s2609_s26 + $0x178] sm:$0xff]  ;;  %v320_v53 = vld [vmem:[%s2609_s26 + $0x110] sm:$0xff]  ;;  %v347_v63 = vld [vmem:[%s2609_s26 + $0x1e8] sm:$0xff] }
  0x2e   : > { %2303 = vmatprep.subr.bf16.mxu1 %v2362_v5  ;;  %v387_v5 = vld [vmem:[%s2609_s26 + $0x328] sm:$0xff] }
  0x2f   : > { %919 = vmatmul.mubr.bf16.gmra.mrb[4].mxu0 %v405_v56  ;;  %v373_v56 = vld [vmem:[%s2609_s26 + $0x2b8] sm:$0xff] }
  0x30   : > { %1016 = vmatmul.mubr.bf16.gmra.mrb[4].mxu1 %v407_v58  ;;  %926 = vmatprep.mubr.bf16.mxu0 %v413_v62  ;;  %v433_v58 = vpack.c.bf16 %v363_v50, %v356_v48  ;;  %v443_v61 = vpack.c.bf16 %v380_v57, %v373_v56  ;;  %v2374_v62 = vld [vmem:[%s3113_s1 + $0x180] sm:$0xff]   ;;  %v325_v48 = vld [vmem:[%s2609_s26 + $0x138] sm:$0xff] }
  0x31   : > { %1023 = vmatprep.mubr.bf16.mxu1 %v415_v1  ;;  %2119 = vmatpush3.bf16.msra.mxu0 %v2363_v6  ;;  %v372_v1 = vld [vmem:[%s2609_s26 + $0x2b0] sm:$0xff]  ;;  %v313_v50 = vld [vmem:[%s2609_s26 + $0xd8] sm:$0xff] }
  0x32   : > { %2311 = vmatpush3.bf16.msra.mxu1 %v2363_v6  ;;  %2120 = vmatprep.subr.bf16.mxu0 %v2364_v15  ;;  %v394_v6 = vld [vmem:[%s2609_s26 + $0x360] sm:$0xff]  ;;  %v442_v8 = vpack.c.bf16 %v379_v2, %v372_v1  ;;  %v348_v1 = vld [vmem:[%s2609_s26 + $0x1f0] sm:$0xff]  ;;  %v355_v2 = vld [vmem:[%s2609_s26 + $0x228] sm:$0xff] }
  0x33   : > { %2304 = vmatprep.subr.bf16.mxu1 %v2364_v15  ;;  %v450_v10 = vpack.c.bf16 %v394_v6, %v387_v5  ;;  %v291_v15 = vld [vmem:[%s2609_s26 + $0x28] sm:$0xff]  ;;  %v431_v5 = vpack.c.bf16 %v354_v0, %v347_v63  ;;  %v432_v6 = vpack.c.bf16 %v355_v2, %v348_v1  ;;  %v2387_v63 = vld [vmem:[%s3117_s5 + $0x20] sm:$0xff]  }
  0x35   : > { %2121 = vmatpush3.bf16.msra.mxu0 %v2365_v17 }
  0x36   : > { %2312 = vmatpush3.bf16.msra.mxu1 %v2365_v17  ;;  %2122 = vmatprep.subr.bf16.mxu0 %v2366_v24  ;;  %v375_v17 = vld [vmem:[%s2609_s26 + $0x2c8] sm:$0xff] }
  0x37   : > { %927 = vmatmul.mubr.bf16.gmra.mrb[8].mxu0 %v412_v12  ;;  %2305 = vmatprep.subr.bf16.mxu1 %v2366_v24  ;;  %v391_v12 = vld [vmem:[%s2609_s26 + $0x348] sm:$0xff]  ;;  %v445_v22 = vpack.c.bf16 %v382_v18, %v375_v17  ;;  %v297_v24 = vld [vmem:[%s2609_s26 + $0x58] sm:$0xff] }
  0x38   : > { %1024 = vmatmul.mubr.bf16.gmra.mrb[8].mxu1 %v414_v13  ;;  %934 = vmatprep.mubr.bf16.mxu0 %v420_v14  ;;  %v386_v13 = vld [vmem:[%s2609_s26 + $0x320] sm:$0xff]  ;;  %v393_v14 = vld [vmem:[%s2609_s26 + $0x358] sm:$0xff]  ;;  %v447_v19 = vpack.c.bf16 %v391_v12, %v384_v11  ;;  %v368_v12 = vld [vmem:[%s2609_s26 + $0x290] sm:$0xff] }
  0x39   : > { %1031 = vmatprep.mubr.bf16.mxu1 %v422_v16  ;;  %2123 = vmatpush3.bf16.msra.mxu0 %v2367_v27  ;;  %v298_v16 = vld [vmem:[%s2609_s26 + $0x60] sm:$0xff]  ;;  %v449_v20 = vpack.c.bf16 %v393_v14, %v386_v13  ;;  %v361_v11 = vld [vmem:[%s2609_s26 + $0x258] sm:$0xff]  ;;  %v376_v13 = vld [vmem:[%s2609_s26 + $0x2d0] sm:$0xff] }
  0x3a   : > { %2313 = vmatpush3.bf16.msra.mxu1 %v2367_v27  ;;  %2124 = vmatprep.subr.bf16.mxu0 %v2368_v32  ;;  %v403_v21 = vpack.c.bf16 %v298_v16, %v291_v15  ;;  %v305_v27 = vld [vmem:[%s2609_s26 + $0x98] sm:$0xff]  ;;  %v383_v14 = vld [vmem:[%s2609_s26 + $0x308] sm:$0xff]  ;;  %v438_v17 = vpack.c.bf16 %v368_v12, %v361_v11 }
  0x3b   : > { %2306 = vmatprep.subr.bf16.mxu1 %v2368_v32  ;;  %v444_v32 = vpack.c.bf16 %v381_v26, %v374_v25  ;;  %v446_v18 = vpack.c.bf16 %v383_v14, %v376_v13  ;;  %v2375_v25 = vld [vmem:[%s3115_s3] sm:$0xff]   ;;  %v2376_v26 = vld [vmem:[%s3115_s3 + $0x8] sm:$0xff]  }
  0x3d   : > { %2125 = vmatpush3.bf16.msra.mxu0 %v2369_v33 }
  0x3e   : > { %2314 = vmatpush3.bf16.msra.mxu1 %v2369_v33  ;;  %2126 = vmatprep.subr.bf16.mxu0 %v2370_v42 }
  0x3f   : > { %935 = vmatmul.mubr.bf16.gmra.mrb[12].mxu0 %v419_v28  ;;  %2307 = vmatprep.subr.bf16.mxu1 %v2370_v42  ;;  %v312_v28 = vld [vmem:[%s2609_s26 + $0xd0] sm:$0xff]  ;;  %v299_v42 = vld [vmem:[%s2609_s26 + $0x68] sm:$0xff] }
  0x40   : > { %1032 = vmatmul.mubr.bf16.gmra.mrb[12].mxu1 %v421_v29  ;;  %942 = vmatprep.mubr.bf16.mxu0 %v427_v30  ;;  %v389_v29 = vld [vmem:[%s2609_s26 + $0x338] sm:$0xff]  ;;  %v396_v30 = vld [vmem:[%s2609_s26 + $0x370] sm:$0xff]  ;;  %v410_v33 = vpack.c.bf16 %v312_v28, %v305_v27 }
  0x41   : > { %1039 = vmatprep.mubr.bf16.mxu1 %v429_v31  ;;  %2127 = vmatpush3.bf16.msra.mxu0 %v2371_v44  ;;  %v402_v31 = vpack.c.bf16 %v297_v24, %v290_v23  ;;  %v452_v34 = vpack.c.bf16 %v396_v30, %v389_v29  ;;  %v2377_v27 = vld [vmem:[%s3115_s3 + $0x10] sm:$0xff]   ;;  %v2378_v28 = vld [vmem:[%s3115_s3 + $0x18] sm:$0xff]   ;;  %v2379_v29 = vld [vmem:[%s3115_s3 + $0x20] sm:$0xff]  }
  0x42   : > { %2315 = vmatpush3.bf16.msra.mxu1 %v2371_v44  ;;  %2128 = vmatprep.subr.bf16.mxu0 %v2372_v49  ;;  %v451_v44 = vpack.c.bf16 %v395_v38, %v388_v37  ;;  %v2380_v30 = vld [vmem:[%s3115_s3 + $0x28] sm:$0xff]  }
  0x43   : > { %2308 = vmatprep.subr.bf16.mxu1 %v2372_v49  ;;  %v306_v49 = vld [vmem:[%s2609_s26 + $0xa0] sm:$0xff] }
  0x44   : > { %v411_v56 = vpack.c.bf16 %v313_v50, %v306_v49 }
  0x45   : > { %2129 = vmatpush3.bf16.msra.mxu0 %v2373_v52 }
  0x46   : > { %2316 = vmatpush3.bf16.msra.mxu1 %v2373_v52  ;;  %v340_v52 = vld [vmem:[%s2609_s26 + $0x1b0] sm:$0xff] }
  0x47   : > { %943 = vmatmul.mubr.bf16.gmra.mrb[16].mxu0 %v426_v43  ;;  %2219 = vmatprep.subr.bf16.mxu1 %v2374_v62  ;;  %v409_v43 = vpack.c.bf16 %v311_v36, %v304_v35  ;;  %v424_v57 = vpack.c.bf16 %v340_v52, %v333_v51  ;;  %v2821_v36 = vld [vmem:[%s3114_s2] ss:$0 sm:$0xff]  ;;  %v2386_v52 = vld [vmem:[%s3117_s5 + $0x18] sm:$0xff]  }
  0x48   : > { %1040 = vmatmul.mubr.bf16.gmra.mrb[16].mxu1 %v428_v45  ;;  %950 = vmatprep.mubr.bf16.mxu0 %v434_v46  ;;  %v417_v45 = vpack.c.bf16 %v326_v40, %v319_v39  ;;  %v404_v46 = vpack.c.bf16 %v299_v42, %v292_v41 }
  0x49   : > { %1047 = vmatprep.mubr.bf16.mxu1 %v436_v47  ;;  %v318_v47 = vld [vmem:[%s2609_s26 + $0x100] sm:$0xff] }
  0x4a   : > { %v416_v55 = vpack.c.bf16 %v325_v48, %v318_v47 }
  0x4f   : > { %951 = vmatmul.mubr.bf16.gmra.mrb[20].mxu0 %v433_v58  ;;  %v418_v58 = vpack.c.bf16 %v327_v54, %v320_v53 }
  0x50   : > { %1048 = vmatmul.mubr.bf16.gmra.mrb[20].mxu1 %v435_v59  ;;  %958 = vmatprep.mubr.bf16.mxu0 %v441_v60  ;;  %v332_v59 = vld [vmem:[%s2609_s26 + $0x170] sm:$0xff]  ;;  %v339_v60 = vld [vmem:[%s2609_s26 + $0x1a8] sm:$0xff] }
  0x51   : > { %1055 = vmatprep.mubr.bf16.mxu1 %v443_v61  ;;  %v334_v61 = vld [vmem:[%s2609_s26 + $0x180] sm:$0xff]  ;;  %v423_v3 = vpack.c.bf16 %v339_v60, %v332_v59 }
  0x57   : > { %959 = vmatmul.mubr.bf16.gmra.mrb[24].mxu0 %v440_v7  ;;  %v346_v7 = vld [vmem:[%s2609_s26 + $0x1e0] sm:$0xff] }
  0x58   : > { %1056 = vmatmul.mubr.bf16.gmra.mrb[24].mxu1 %v442_v8  ;;  %966 = vmatprep.mubr.bf16.mxu0 %v448_v9  ;;  %v353_v8 = vld [vmem:[%s2609_s26 + $0x218] sm:$0xff]  ;;  %v362_v9 = vld [vmem:[%s2609_s26 + $0x260] sm:$0xff] }
  0x59   : > { %1063 = vmatprep.mubr.bf16.mxu1 %v450_v10  ;;  %v369_v10 = vld [vmem:[%s2609_s26 + $0x298] sm:$0xff]  ;;  %v430_v15 = vpack.c.bf16 %v353_v8, %v346_v7 }
  0x5a   : > { %v439_v16 = vpack.c.bf16 %v369_v10, %v362_v9 }
  0x5f   : > { %967 = vmatmul.mubr.bf16.gmra.mrb[28].mxu0 %v447_v19  ;;  %v360_v19 = vld [vmem:[%s2609_s26 + $0x250] sm:$0xff] }
  0x60   : > { %1064 = vmatmul.mubr.bf16.gmra.mrb[28].mxu1 %v449_v20  ;;  %1104 = vmatprep.mubr.bf16.mxu0 %v403_v21  ;;  %v367_v20 = vld [vmem:[%s2609_s26 + $0x288] sm:$0xff]  ;;  %v390_v21 = vld [vmem:[%s2609_s26 + $0x340] sm:$0xff] }
  0x61   : > { %1152 = vmatprep.mubr.bf16.mxu1 %v445_v22  ;;  %v397_v22 = vld [vmem:[%s2609_s26 + $0x378] sm:$0xff]  ;;  %v437_v23 = vpack.c.bf16 %v367_v20, %v360_v19 }
  0x62   : > { %v453_v24 = vpack.c.bf16 %v397_v22, %v390_v21 }
  0x67   : > { %1105 = vmatmul.mubr.bf16.vlgmr.msra.gmra.mrb[32].mxu0 %v402_v31  ;;  %v2381_v31 = vld [vmem:[%s3115_s3 + $0x30] sm:$0xff]  }
  0x68   : > { %1153 = vmatmul.mubr.bf16.vlgmr.msra.gmra.mrb[32].mxu1 %v444_v32  ;;  %1112 = vmatprep.mubr.bf16.mxu0 %v410_v33  ;;  %v2382_v32 = vld [vmem:[%s3115_s3 + $0x38] sm:$0xff]   ;;  %v2383_v33 = vld [vmem:[%s3117_s5] sm:$0xff]  }
  0x69   : > { %1160 = vmatprep.mubr.bf16.mxu1 %v452_v34  ;;  %2220 = vmatpush3.bf16.msra.mxu1 %v2374_v62  ;;  %v341_v62 = vld [vmem:[%s2609_s26 + $0x1b8] sm:$0xff]  ;;  %v2384_v34 = vld [vmem:[%s3117_s5 + $0x8] sm:$0xff]  }
  0x6a   : > { %v425_v4 = vpack.c.bf16 %v341_v62, %v334_v61  ;;  %2237 = vmatprep.subr.bf16.mxu1 %v2375_v25  ;;  %2269 = vmatprep.subr.bf16.mxu0 %v2383_v33 }
  0x6b   : > { %2270 = vmatpush3.bf16.msra.mxu0 %v2383_v33 }
  0x6c   : > { %2271 = vmatprep.subr.bf16.mxu0 %v2384_v34 }
  0x6f   : > { %1113 = vmatmul.mubr.bf16.gmra.mrb[36].mxu0 %v409_v43 }
  0x70   : > { %1161 = vmatmul.mubr.bf16.gmra.mrb[36].mxu1 %v451_v44  ;;  %1120 = vmatprep.mubr.bf16.mxu0 %v417_v45  ;;  %v2385_v45 = vld [vmem:[%s3117_s5 + $0x10] sm:$0xff]  }
  0x71   : > { %2221 = vmatprep.mubr.msk.bf16.mxu1 %vm853_vm0, %v404_v46  ;;  %2272 = vmatpush3.bf16.msra.mxu0 %v2384_v34 }
  0x72   : > { %2273 = vmatprep.subr.bf16.mxu0 %v2385_v45 }
  0x75   : > { %2274 = vmatpush3.bf16.msra.mxu0 %v2385_v45 }
  0x76   : > { %2275 = vmatprep.subr.bf16.mxu0 %v2386_v52 }
  0x77   : > { %1121 = vmatmul.mubr.bf16.gmra.mrb[40].mxu0 %v416_v55 }
  0x78   : > { %2222 = vmatmul.mubr.msk.bf16.vlgmr.msra.gmra.mrb[40].mxu1 %vm853_vm0, %v411_v56  ;;  %1128 = vmatprep.mubr.bf16.mxu0 %v424_v57 }
  0x79   : > { %2225 = vmatprep.mubr.msk.bf16.mxu1 %vm853_vm0, %v418_v58  ;;  %2238 = vmatpush3.bf16.msra.mxu1 %v2375_v25 }
  0x7a   : > { %2239 = vmatprep.subr.bf16.mxu1 %v2376_v26  ;;  %2276 = vmatpush3.bf16.msra.mxu0 %v2386_v52 }
  0x7b   : > { %2277 = vmatprep.subr.bf16.mxu0 %v2387_v63 }
  0x7d   : > { %2240 = vmatpush3.bf16.msra.mxu1 %v2376_v26 }
  0x7e   : > { %2241 = vmatprep.subr.bf16.mxu1 %v2377_v27  ;;  %2278 = vmatpush3.bf16.msra.mxu0 %v2387_v63 }
  0x7f   : > { %1129 = vmatmul.mubr.bf16.gmra.mrb[44].mxu0 %v423_v3 }
  0x80   : > { %2226 = vmatmul.mubr.msk.bf16.gmra.mrb[44].mxu1 %vm853_vm0, %v425_v4  ;;  %1136 = vmatprep.mubr.bf16.mxu0 %v431_v5 }
  0x81   : > { %2229 = vmatprep.mubr.msk.bf16.mxu1 %vm853_vm0, %v432_v6  ;;  %2242 = vmatpush3.bf16.msra.mxu1 %v2377_v27  ;;  %v2388_v6 = vld [vmem:[%s3117_s5 + $0x28] sm:$0xff]  }
  0x82   : > { %2243 = vmatprep.subr.bf16.mxu1 %v2378_v28  ;;  %2279 = vmatprep.subr.bf16.mxu0 %v2388_v6 }
  0x83   : > { %2280 = vmatpush3.bf16.msra.mxu0 %v2388_v6 }
  0x85   : > { %2244 = vmatpush3.bf16.msra.mxu1 %v2378_v28 }
  0x86   : > { %2245 = vmatprep.subr.bf16.mxu1 %v2379_v29 }
  0x87   : > { %1137 = vmatmul.mubr.bf16.gmra.mrb[48].mxu0 %v430_v15 }
  0x88   : > { %2230 = vmatmul.mubr.msk.bf16.gmra.mrb[48].mxu1 %vm853_vm0, %v439_v16  ;;  %1144 = vmatprep.mubr.bf16.mxu0 %v438_v17 }
  0x89   : > { %2233 = vmatprep.mubr.msk.bf16.mxu1 %vm853_vm0, %v446_v18  ;;  %2246 = vmatpush3.bf16.msra.mxu1 %v2379_v29 }
  0x8a   : > { %2247 = vmatprep.subr.bf16.mxu1 %v2380_v30 }
  0x8d   : > { %2248 = vmatpush3.bf16.msra.mxu1 %v2380_v30 }
  0x8e   : > { %2249 = vmatprep.subr.bf16.mxu1 %v2381_v31 }
  0x8f   : > { %1145 = vmatmul.mubr.bf16.gmra.mrb[52].mxu0 %v437_v23 }
  0x90   : > { %2234 = vmatmul.mubr.msk.bf16.gmra.mrb[52].mxu1 %vm853_vm0, %v453_v24 }
  0x91   : > { %2250 = vmatpush3.bf16.msra.mxu1 %v2381_v31 }
  0x92   : > { %2251 = vmatprep.subr.bf16.mxu1 %v2382_v32 }
  0x95   : > { %2252 = vmatpush3.bf16.msra.mxu1 %v2382_v32 }
  0xfa   : > { %v2002_v35 = vpop.f32.mrb[0].mxu0 }
  0xfb   : > { %v2003_v37 = vpop.f32.mrb[1].mxu0  ;;  %v2066_v38 = vpop.f32.mrb[0].mxu1 }
  0xfc   : > { %v2004_v39 = vadd.f32 %v2003_v37, %v2002_v35  ;;  %v2005_v40 = vpop.f32.mrb[2].mxu0  ;;  %v2067_v41 = vpop.f32.mrb[1].mxu1 }
  0xfd   : > { %v2006_v42 = vpop.f32.mrb[3].mxu0  ;;  %v2068_v43 = vadd.f32 %v2067_v41, %v2066_v38  ;;  %v2069_v44 = vpop.f32.mrb[2].mxu1 }
  0xfe   : > { %v913_v46 = vadd.f32 %v2004_v39, %v2821_v36  ;;  %v2007_v47 = vadd.f32 %v2006_v42, %v2005_v40  ;;  %v2070_v48 = vpop.f32.mrb[3].mxu1 }
  0xff   : > { %v2071_v49 = vadd.f32 %v2070_v48, %v2069_v44 }
 0x100   : > { %v916_v50 = vadd.f32 %v2007_v47, %v2821_v36  ;;  %v2828_v51 = vadd.f32 %v2068_v43, %v913_v46 }
 0x102   : > { %v2833_v53 = vadd.f32 %v2071_v49, %v916_v50  ;;  %v2008_v54 = vpop.f32.mrb[4].mxu0 }
 0x103   : > { %v2009_v55 = vpop.f32.mrb[5].mxu0  ;;  %v2072_v56 = vpop.f32.mrb[4].mxu1 }
 0x104   : > { %v2010_v57 = vadd.f32 %v2009_v55, %v2008_v54  ;;  %v2011_v58 = vpop.f32.mrb[6].mxu0  ;;  %v2073_v59 = vpop.f32.mrb[5].mxu1 }
 0x105   : > { %v2012_v60 = vpop.f32.mrb[7].mxu0  ;;  %v2074_v61 = vadd.f32 %v2073_v59, %v2072_v56  ;;  %v2075_v62 = vpop.f32.mrb[6].mxu1 }
 0x106   : > { %v921_v0 = vadd.f32 %v2010_v57, %v2821_v36  ;;  %v2013_v1 = vadd.f32 %v2012_v60, %v2011_v58  ;;  %v2076_v2 = vpop.f32.mrb[7].mxu1 }
 0x107   : > { %v2077_v3 = vadd.f32 %v2076_v2, %v2075_v62 }
 0x108   : > { %v924_v4 = vadd.f32 %v2013_v1, %v2821_v36  ;;  %v2840_v5 = vadd.f32 %v2074_v61, %v921_v0 }
 0x10a   : > { %v2845_v7 = vadd.f32 %v2077_v3, %v924_v4  ;;  %v2014_v8 = vpop.f32.mrb[8].mxu0 }
 0x10b   : > { %v2015_v9 = vpop.f32.mrb[9].mxu0  ;;  %v2078_v10 = vpop.f32.mrb[8].mxu1 }
 0x10c   : > { %v2016_v11 = vadd.f32 %v2015_v9, %v2014_v8  ;;  %v2017_v12 = vpop.f32.mrb[10].mxu0  ;;  %v2079_v13 = vpop.f32.mrb[9].mxu1 }
 0x10d   : > { %v2018_v14 = vpop.f32.mrb[11].mxu0  ;;  %v2080_v15 = vadd.f32 %v2079_v13, %v2078_v10  ;;  %v2081_v16 = vpop.f32.mrb[10].mxu1 }
 0x10e   : > { %v929_v17 = vadd.f32 %v2016_v11, %v2821_v36  ;;  %v2019_v18 = vadd.f32 %v2018_v14, %v2017_v12  ;;  %v2082_v19 = vpop.f32.mrb[11].mxu1 }
 0x10f   : > { %v2083_v20 = vadd.f32 %v2082_v19, %v2081_v16 }
 0x110   : > { %v932_v21 = vadd.f32 %v2019_v18, %v2821_v36  ;;  %v2849_v22 = vadd.f32 %v2080_v15, %v929_v17 }
 0x112   : > { %v2851_v23 = vadd.f32 %v2083_v20, %v932_v21  ;;  %v2020_v24 = vpop.f32.mrb[12].mxu0 }
 0x113   : > { %v2021_v25 = vpop.f32.mrb[13].mxu0  ;;  %v2084_v26 = vpop.f32.mrb[12].mxu1 }
 0x114   : > { %v2022_v27 = vadd.f32 %v2021_v25, %v2020_v24  ;;  %v2023_v28 = vpop.f32.mrb[14].mxu0  ;;  %v2085_v29 = vpop.f32.mrb[13].mxu1 }
 0x115   : > { %v2024_v30 = vpop.f32.mrb[15].mxu0  ;;  %v2086_v31 = vadd.f32 %v2085_v29, %v2084_v26  ;;  %v2087_v32 = vpop.f32.mrb[14].mxu1 }
 0x116   : > { %v937_v33 = vadd.f32 %v2022_v27, %v2821_v36  ;;  %v2025_v34 = vadd.f32 %v2024_v30, %v2023_v28  ;;  %v2088_v35 = vpop.f32.mrb[15].mxu1 }
 0x117   : > { %v2089_v37 = vadd.f32 %v2088_v35, %v2087_v32 }
 0x118   : > { %v940_v38 = vadd.f32 %v2025_v34, %v2821_v36  ;;  %v2855_v39 = vadd.f32 %v2086_v31, %v937_v33 }
 0x11a   : > { %v2857_v40 = vadd.f32 %v2089_v37, %v940_v38  ;;  %v2026_v41 = vpop.f32.mrb[16].mxu0 }
 0x11b   : > { %v2027_v42 = vpop.f32.mrb[17].mxu0  ;;  %v2090_v43 = vpop.f32.mrb[16].mxu1 }
 0x11c   : > { %v2028_v44 = vadd.f32 %v2027_v42, %v2026_v41  ;;  %v2029_v45 = vpop.f32.mrb[18].mxu0  ;;  %v2091_v46 = vpop.f32.mrb[17].mxu1 }
 0x11d   : > { %v2030_v47 = vpop.f32.mrb[19].mxu0  ;;  %v2092_v48 = vadd.f32 %v2091_v46, %v2090_v43  ;;  %v2093_v49 = vpop.f32.mrb[18].mxu1 }
 0x11e   : > { %v945_v50 = vadd.f32 %v2028_v44, %v2821_v36  ;;  %v2031_v52 = vadd.f32 %v2030_v47, %v2029_v45  ;;  %v2094_v54 = vpop.f32.mrb[19].mxu1 }
 0x11f   : > { %v2095_v55 = vadd.f32 %v2094_v54, %v2093_v49 }
 0x120   : > { %v948_v56 = vadd.f32 %v2031_v52, %v2821_v36  ;;  %v2861_v57 = vadd.f32 %v2092_v48, %v945_v50 }
 0x122   : > { %v2863_v58 = vadd.f32 %v2095_v55, %v948_v56  ;;  %v2032_v59 = vpop.f32.mrb[20].mxu0 }
 0x123   : > { %v2033_v60 = vpop.f32.mrb[21].mxu0  ;;  %v2096_v61 = vpop.f32.mrb[20].mxu1 }
 0x124   : > { %v2034_v62 = vadd.f32 %v2033_v60, %v2032_v59  ;;  %v2035_v63 = vpop.f32.mrb[22].mxu0  ;;  %v2097_v0 = vpop.f32.mrb[21].mxu1 }
 0x125   : > { %v2036_v1 = vpop.f32.mrb[23].mxu0  ;;  %v2098_v2 = vadd.f32 %v2097_v0, %v2096_v61  ;;  %v2099_v3 = vpop.f32.mrb[22].mxu1 }
 0x126   : > { %v953_v4 = vadd.f32 %v2034_v62, %v2821_v36  ;;  %v2037_v6 = vadd.f32 %v2036_v1, %v2035_v63  ;;  %v2100_v8 = vpop.f32.mrb[23].mxu1 }
 0x127   : > { %v2101_v9 = vadd.f32 %v2100_v8, %v2099_v3 }
 0x128   : > { %v956_v10 = vadd.f32 %v2037_v6, %v2821_v36  ;;  %v2867_v11 = vadd.f32 %v2098_v2, %v953_v4 }
 0x12a   : > { %v2869_v12 = vadd.f32 %v2101_v9, %v956_v10  ;;  %v2038_v13 = vpop.f32.mrb[24].mxu0 }
 0x12b   : > { %v2039_v14 = vpop.f32.mrb[25].mxu0  ;;  %v2102_v15 = vpop.f32.mrb[24].mxu1 }
 0x12c   : > { %v2040_v16 = vadd.f32 %v2039_v14, %v2038_v13  ;;  %v2041_v17 = vpop.f32.mrb[26].mxu0  ;;  %v2103_v18 = vpop.f32.mrb[25].mxu1 }
 0x12d   : > { %v2042_v19 = vpop.f32.mrb[27].mxu0  ;;  %v2104_v20 = vadd.f32 %v2103_v18, %v2102_v15  ;;  %v2105_v21 = vpop.f32.mrb[26].mxu1 }
 0x12e   : > { %v961_v24 = vadd.f32 %v2040_v16, %v2821_v36  ;;  %v2043_v25 = vadd.f32 %v2042_v19, %v2041_v17  ;;  %v2106_v26 = vpop.f32.mrb[27].mxu1 }
 0x12f   : > { %v2107_v27 = vadd.f32 %v2106_v26, %v2105_v21 }
 0x130   : > { %v964_v28 = vadd.f32 %v2043_v25, %v2821_v36  ;;  %v1058_v29 = vadd.f32 %v2104_v20, %v961_v24 }
 0x132   : > { %v1061_v30 = vadd.f32 %v2107_v27, %v964_v28  ;;  %v2044_v31 = vpop.f32.mrb[28].mxu0 }
 0x133   : > { %v2045_v32 = vpop.f32.mrb[29].mxu0  ;;  %v2108_v33 = vpop.f32.mrb[28].mxu1 }
 0x134   : > { %v2046_v34 = vadd.f32 %v2045_v32, %v2044_v31  ;;  %v2047_v35 = vpop.f32.mrb[30].mxu0  ;;  %v2109_v37 = vpop.f32.mrb[29].mxu1 }
 0x135   : > { %v2048_v38 = vpop.f32.mrb[31].mxu0  ;;  %v2110_v41 = vadd.f32 %v2109_v37, %v2108_v33  ;;  %v2111_v42 = vpop.f32.mrb[30].mxu1 }
 0x136   : > { %v969_v43 = vadd.f32 %v2046_v34, %v2821_v36  ;;  %v2049_v44 = vadd.f32 %v2048_v38, %v2047_v35  ;;  %v2112_v45 = vpop.f32.mrb[31].mxu1 }
 0x137   : > { %v2113_v46 = vadd.f32 %v2112_v45, %v2111_v42 }
 0x138   : > { %v972_v47 = vadd.f32 %v2049_v44, %v2821_v36  ;;  %v1066_v48 = vadd.f32 %v2110_v41, %v969_v43 }
 0x13a   : > { %v1069_v49 = vadd.f32 %v2113_v46, %v972_v47  ;;  %v2130_v50 = vpop.f32.mrb[32].mxu0 }
 0x13b   : > { %v2166_v52 = vpop.f32.mrb[32].mxu1  ;;  %v2131_v54 = vpop.f32.mrb[33].mxu0 }
 0x13c   : > { %v2132_v55 = vadd.f32 %v2131_v54, %v2130_v50  ;;  %v2167_v56 = vpop.f32.mrb[33].mxu1  ;;  %v2133_v59 = vpop.f32.mrb[34].mxu0 }
 0x13d   : > { %v2168_v60 = vadd.f32 %v2167_v56, %v2166_v52  ;;  %v2169_v61 = vpop.f32.mrb[34].mxu1  ;;  %v2134_v62 = vpop.f32.mrb[35].mxu0 }
 0x13e   : > { %v2135_v63 = vadd.f32 %v2134_v62, %v2133_v59  ;;  %v2170_v0 = vpop.f32.mrb[35].mxu1  ;;  %v1107_v1 = vadd.f32 %v2132_v55, %v2828_v51 }
 0x13f   : > { %v2171_v2 = vadd.f32 %v2170_v0, %v2169_v61  ;;  %v2876_v3 = vadd.f32 %v2168_v60, %v1058_v29 }
 0x140   : > { %v1110_v36 = vadd.f32 %v2135_v63, %v2833_v53 }
 0x141   : > { %v2879_v4 = vadd.f32 %v2171_v2, %v1061_v30 }
 0x142   : > { %v2136_v6 = vpop.f32.mrb[36].mxu0 }
 0x143   : > { %v2172_v8 = vpop.f32.mrb[36].mxu1  ;;  %v2137_v9 = vpop.f32.mrb[37].mxu0 }
 0x144   : > { %v2138_v10 = vadd.f32 %v2137_v9, %v2136_v6  ;;  %v2173_v13 = vpop.f32.mrb[37].mxu1  ;;  %v2139_v14 = vpop.f32.mrb[38].mxu0 }
 0x145   : > { %v2174_v15 = vadd.f32 %v2173_v13, %v2172_v8  ;;  %v2175_v16 = vpop.f32.mrb[38].mxu1  ;;  %v2140_v17 = vpop.f32.mrb[39].mxu0 }
 0x146   : > { %v2141_v18 = vadd.f32 %v2140_v17, %v2139_v14  ;;  %v2176_v19 = vpop.f32.mrb[39].mxu1  ;;  %v1115_v51 = vadd.f32 %v2138_v10, %v2840_v5 }
 0x147   : > { %v2177_v20 = vadd.f32 %v2176_v19, %v2175_v16  ;;  %v2882_v21 = vadd.f32 %v2174_v15, %v1066_v48 }
 0x148   : > { %v1118_v53 = vadd.f32 %v2141_v18, %v2845_v7 }
 0x149   : > { %v2885_v24 = vadd.f32 %v2177_v20, %v1069_v49 }
 0x14a   : > { %v2142_v25 = vpop.f32.mrb[40].mxu0 }
 0x14b   : > { %v2223_v26 = vpop.f32.mrb[40].mxu1  ;;  %v2143_v27 = vpop.f32.mrb[41].mxu0 }
 0x14c   : > { %v1212_v28 = vadd.f32 %v2223_v26, %v1115_v51  ;;  %v2144_v29 = vadd.f32 %v2143_v27, %v2142_v25  ;;  %v1203_v30 = vpop.f32.mrb[41].mxu1  ;;  %v2145_v31 = vpop.f32.mrb[42].mxu0 }
 0x14d   : > { %v1204_v32 = vadd.f32 %v1203_v30, %v1107_v1  ;;  %v2224_v33 = vpop.f32.mrb[42].mxu1  ;;  %v2146_v34 = vpop.f32.mrb[43].mxu0 }
 0x14e   : > { %v1215_v35 = vadd.f32 %v2224_v33, %v1118_v53  ;;  %v2147_v37 = vadd.f32 %v2146_v34, %v2145_v31  ;;  %v1206_v5 = vpop.f32.mrb[43].mxu1  ;;  %v1123_v38 = vadd.f32 %v2144_v29, %v2849_v22  ;;  %v1268_v42 = vmax.f32 %v1212_v28, 0.0 }
 0x14f   : > { %v1207_v41 = vadd.f32 %v1206_v5, %v1110_v36  ;;  %v1266_v44 = vmax.f32 %v1204_v32, 0.0 }
 0x150   : > { %v1269_v7 = vmax.f32 %v1215_v35, 0.0  ;;  %v1126_v43 = vadd.f32 %v2147_v37, %v2851_v23 }
 0x151   : > { %v1267_v45 = vmax.f32 %v1207_v41, 0.0 }
 0x152   : > { %v1283_v46 = vpack.c.bf16 %v1269_v7, %v1268_v42  ;;  %v2148_v47 = vpop.f32.mrb[44].mxu0 }
 0x153   : > { %v1282_v48 = vpack.c.bf16 %v1267_v45, %v1266_v44  ;;  %v2227_v49 = vpop.f32.mrb[44].mxu1  ;;  %v2149_v50 = vpop.f32.mrb[45].mxu0 }
 0x154   : > { %v2150_v52 = vadd.f32 %v2149_v50, %v2148_v47  ;;  %v1219_v54 = vpop.f32.mrb[45].mxu1  ;;  %v2151_v55 = vpop.f32.mrb[46].mxu0 }
 0x155   : > { %v1220_v56 = vadd.f32 %v1219_v54, %v1123_v38  ;;  %v2228_v59 = vpop.f32.mrb[46].mxu1  ;;  %2253 = vmatprep.mubr.bf16.mxu1 %v1282_v48  ;;  %v2152_v60 = vpop.f32.mrb[47].mxu0 }
 0x156   : > { %v1131_v22 = vadd.f32 %v2150_v52, %v2855_v39  ;;  %v2153_v61 = vadd.f32 %v2152_v60, %v2151_v55  ;;  %v1222_v62 = vpop.f32.mrb[47].mxu1  ;;  %2254 = vmatmul.mubr.bf16.vlgmr.msra.gmra.mrb[56].mxu1 %v1283_v46 }
 0x157   : > { %v1223_v23 = vadd.f32 %v1222_v62, %v1126_v43  ;;  %v1270_v1 = vmax.f32 %v1220_v56, 0.0 }
 0x158   : > { %v1228_v63 = vadd.f32 %v2227_v49, %v1131_v22  ;;  %v1134_v0 = vadd.f32 %v2153_v61, %v2857_v40 }
 0x159   : > { %v1271_v2 = vmax.f32 %v1223_v23, 0.0 }
 0x15a   : > { %v1231_v36 = vadd.f32 %v2228_v59, %v1134_v0  ;;  %v2154_v6 = vpop.f32.mrb[48].mxu0  ;;  %v1272_v13 = vmax.f32 %v1228_v63, 0.0 }
 0x15b   : > { %v1284_v8 = vpack.c.bf16 %v1271_v2, %v1270_v1  ;;  %v2155_v9 = vpop.f32.mrb[49].mxu0  ;;  %v2231_v10 = vpop.f32.mrb[48].mxu1 }
 0x15c   : > { %v1273_v14 = vmax.f32 %v1231_v36, 0.0  ;;  %v2156_v15 = vadd.f32 %v2155_v9, %v2154_v6  ;;  %v2157_v16 = vpop.f32.mrb[50].mxu0  ;;  %v1235_v17 = vpop.f32.mrb[49].mxu1 }
 0x15d   : > { %2257 = vmatprep.mubr.bf16.mxu1 %v1284_v8  ;;  %v2158_v39 = vpop.f32.mrb[51].mxu0  ;;  %v2232_v18 = vpop.f32.mrb[50].mxu1 }
 0x15e   : > { %v2159_v19 = vadd.f32 %v2158_v39, %v2157_v16  ;;  %v1139_v51 = vadd.f32 %v2156_v15, %v2861_v57  ;;  %v1285_v20 = vpack.c.bf16 %v1273_v14, %v1272_v13  ;;  %v1238_v40 = vpop.f32.mrb[51].mxu1 }
 0x160   : > { %v1236_v53 = vadd.f32 %v1235_v17, %v1139_v51  ;;  %2258 = vmatmul.mubr.bf16.gmra.mrb[60].mxu1 %v1285_v20  ;;  %v1142_v25 = vadd.f32 %v2159_v19, %v2863_v58 }
 0x162   : > { %v1239_v26 = vadd.f32 %v1238_v40, %v1142_v25  ;;  %v2160_v27 = vpop.f32.mrb[52].mxu0  ;;  %v1274_v30 = vmax.f32 %v1236_v53, 0.0 }
 0x163   : > { %v2235_v28 = vpop.f32.mrb[52].mxu1  ;;  %v2161_v29 = vpop.f32.mrb[53].mxu0 }
 0x164   : > { %v1275_v31 = vmax.f32 %v1239_v26, 0.0  ;;  %v1260_v32 = vadd.f32 %v2235_v28, %v2882_v21  ;;  %v2162_v33 = vadd.f32 %v2161_v29, %v2160_v27  ;;  %v1251_v34 = vpop.f32.mrb[53].mxu1  ;;  %v2163_v35 = vpop.f32.mrb[54].mxu0 }
 0x165   : > { %v1252_v37 = vadd.f32 %v1251_v34, %v2876_v3  ;;  %v2236_v57 = vpop.f32.mrb[54].mxu1  ;;  %v2164_v5 = vpop.f32.mrb[55].mxu0 }
 0x166   : > { %v1286_v38 = vpack.c.bf16 %v1275_v31, %v1274_v30  ;;  %v1147_v41 = vadd.f32 %v2162_v33, %v2867_v11  ;;  %v1263_v58 = vadd.f32 %v2236_v57, %v2885_v24  ;;  %v1254_v42 = vpop.f32.mrb[55].mxu1  ;;  %v2165_v7 = vadd.f32 %v2164_v5, %v2163_v35  ;;  %v1966_v24 = vld [vmem:[%s3116_s4] ss:$0 sm:$0xff] }
 0x167   : > { %v1255_v43 = vadd.f32 %v1254_v42, %v2879_v4  ;;  %v1280_v44 = vmax.f32 %v1260_v32, 0.0  ;;  %v1278_v21 = vmax.f32 %v1252_v37, 0.0  ;;  %v2389_v4 = vld [vmem:[%s3117_s5 + $0x30] sm:$0xff]  }
 0x168   : > { %v1244_v45 = vadd.f32 %v2231_v10, %v1147_v41  ;;  %v1281_v46 = vmax.f32 %v1263_v58, 0.0  ;;  %2261 = vmatprep.mubr.bf16.mxu1 %v1286_v38  ;;  %v1150_v47 = vadd.f32 %v2165_v7, %v2869_v12  ;;  %2281 = vmatprep.subr.bf16.mxu0 %v2389_v4  ;;  %v2390_v12 = vld [vmem:[%s3117_s5 + $0x38] sm:$0xff]  }
 0x169   : > { %v1279_v48 = vmax.f32 %v1255_v43, 0.0  ;;  %2282 = vmatpush3.bf16.msra.mxu0 %v2389_v4 }
 0x16a   : > { %v1289_v3 = vpack.c.bf16 %v1281_v46, %v1280_v44  ;;  %v1247_v49 = vadd.f32 %v2232_v18, %v1150_v47  ;;  %v1276_v52 = vmax.f32 %v1244_v45, 0.0  ;;  %2283 = vmatprep.subr.bf16.mxu0 %v2390_v12 }
 0x16b   : > { %v1288_v50 = vpack.c.bf16 %v1279_v48, %v1278_v21 }
 0x16c   : > { %v1277_v54 = vmax.f32 %v1247_v49, 0.0  ;;  %v1975_v49 = vld [vmem:[%s3118_s6] ss:$0 sm:$0xff] }
 0x16d   : > { %2284 = vmatpush3.bf16.msra.mxu0 %v2390_v12 }
 0x16e   : > { %v1287_v11 = vpack.c.bf16 %v1277_v54, %v1276_v52 }
 0x170   : > { %2262 = vmatmul.mubr.bf16.gmra.mrb[64].mxu1 %v1287_v11 }
 0x171   : > { %2265 = vmatprep.mubr.bf16.mxu1 %v1288_v50 }
 0x178   : > { %2266 = vmatmul.mubr.bf16.gmra.mrb[68].mxu1 %v1289_v3 }
 0x229   : > { %v2255_v55 = vpop.f32.mrb[56].mxu1 }
 0x22a   : > { %v1404_v56 = vadd.f32 %v2255_v55, %v1966_v24  ;;  %v1395_v59 = vpop.f32.mrb[57].mxu1 }
 0x22b   : > { %v1396_v60 = vadd.f32 %v1966_v24, %v1395_v59  ;;  %v2256_v22 = vpop.f32.mrb[58].mxu1 }
 0x22c   : > { %v1407_v61 = vadd.f32 %v2256_v22, %v1966_v24  ;;  %v1398_v62 = vpop.f32.mrb[59].mxu1  ;;  %v1460_v63 = vmax.f32 %v1404_v56, 0.0 }
 0x22d   : > { %v1399_v23 = vadd.f32 %v1966_v24, %v1398_v62  ;;  %v1458_v1 = vmax.f32 %v1396_v60, 0.0 }
 0x22e   : > { %v1461_v0 = vmax.f32 %v1407_v61, 0.0 }
 0x22f   : > { %v1459_v2 = vmax.f32 %v1399_v23, 0.0 }
 0x230   : > { %v1475_v36 = vpack.c.bf16 %v1461_v0, %v1460_v63 }
 0x231   : > { %v1474_v6 = vpack.c.bf16 %v1459_v2, %v1458_v1 }
 0x233   : > { %2285 = vmatprep.mubr.bf16.mxu0 %v1474_v6  ;;  %v2259_v8 = vpop.f32.mrb[60].mxu1 }
 0x234   : > { %v1420_v9 = vadd.f32 %v2259_v8, %v1966_v24  ;;  %2286 = vmatmul.mubr.bf16.vlgmr.msra.gmra.mrb[56].mxu0 %v1475_v36  ;;  %v1411_v10 = vpop.f32.mrb[61].mxu1 }
 0x235   : > { %v1412_v13 = vadd.f32 %v1966_v24, %v1411_v10  ;;  %v2260_v14 = vpop.f32.mrb[62].mxu1 }
 0x236   : > { %v1423_v15 = vadd.f32 %v2260_v14, %v1966_v24  ;;  %v1414_v16 = vpop.f32.mrb[63].mxu1  ;;  %v1464_v39 = vmax.f32 %v1420_v9, 0.0 }
 0x237   : > { %v1415_v17 = vadd.f32 %v1966_v24, %v1414_v16  ;;  %v1462_v19 = vmax.f32 %v1412_v13, 0.0 }
 0x238   : > { %v1465_v18 = vmax.f32 %v1423_v15, 0.0 }
 0x239   : > { %v1463_v51 = vmax.f32 %v1415_v17, 0.0 }
 0x23a   : > { %v1477_v20 = vpack.c.bf16 %v1465_v18, %v1464_v39 }
 0x23b   : > { %v1476_v40 = vpack.c.bf16 %v1463_v51, %v1462_v19 }
 0x23d   : > { %2289 = vmatprep.mubr.bf16.mxu0 %v1476_v40 }
 0x23e   : > { %2290 = vmatmul.mubr.bf16.gmra.mrb[60].mxu0 %v1477_v20 }
 0x243   : > { %v2263_v53 = vpop.f32.mrb[64].mxu1 }
 0x244   : > { %v1436_v25 = vadd.f32 %v2263_v53, %v1966_v24  ;;  %v1427_v26 = vpop.f32.mrb[65].mxu1 }
 0x245   : > { %v1428_v27 = vadd.f32 %v1966_v24, %v1427_v26  ;;  %v2264_v28 = vpop.f32.mrb[66].mxu1 }
 0x246   : > { %v1439_v29 = vadd.f32 %v2264_v28, %v1966_v24  ;;  %v1430_v30 = vpop.f32.mrb[67].mxu1  ;;  %v1468_v32 = vmax.f32 %v1436_v25, 0.0 }
 0x247   : > { %v1431_v31 = vadd.f32 %v1966_v24, %v1430_v30  ;;  %v1466_v34 = vmax.f32 %v1428_v27, 0.0 }
 0x248   : > { %v1469_v33 = vmax.f32 %v1439_v29, 0.0 }
 0x249   : > { %v1467_v35 = vmax.f32 %v1431_v31, 0.0 }
 0x24a   : > { %v1479_v37 = vpack.c.bf16 %v1469_v33, %v1468_v32 }
 0x24b   : > { %v1478_v57 = vpack.c.bf16 %v1467_v35, %v1466_v34  ;;  %v2267_v5 = vpop.f32.mrb[68].mxu1 }
 0x24c   : > { %v1452_v38 = vadd.f32 %v2267_v5, %v1966_v24  ;;  %v1443_v41 = vpop.f32.mrb[69].mxu1 }
 0x24d   : > { %v1444_v58 = vadd.f32 %v1966_v24, %v1443_v41  ;;  %v2268_v42 = vpop.f32.mrb[70].mxu1  ;;  %2293 = vmatprep.mubr.bf16.mxu0 %v1478_v57 }
 0x24e   : > { %v1455_v7 = vadd.f32 %v2268_v42, %v1966_v24  ;;  %v1446_v43 = vpop.f32.mrb[71].mxu1  ;;  %2294 = vmatmul.mubr.bf16.gmra.mrb[64].mxu0 %v1479_v37  ;;  %v1472_v45 = vmax.f32 %v1452_v38, 0.0 }
 0x24f   : > { %v1447_v44 = vadd.f32 %v1966_v24, %v1446_v43  ;;  %v1470_v21 = vmax.f32 %v1444_v58, 0.0 }
 0x250   : > { %v1473_v46 = vmax.f32 %v1455_v7, 0.0 }
 0x251   : > { %v1471_v47 = vmax.f32 %v1447_v44, 0.0 }
 0x252   : > { %v1481_v48 = vpack.c.bf16 %v1473_v46, %v1472_v45 }
 0x253   : > { %v1480_v3 = vpack.c.bf16 %v1471_v47, %v1470_v21 }
 0x255   : > { %2297 = vmatprep.mubr.bf16.mxu0 %v1480_v3 }
 0x256   : > { %2298 = vmatmul.mubr.bf16.gmra.mrb[68].mxu0 %v1481_v48 }
 0x307   : > { %v2287_v50 = vpop.f32.mrb[56].mxu0 }
 0x308   : > { %v2911_v52 = vadd.f32 %v2287_v50, %v1975_v49  ;;  %v1587_v54 = vpop.f32.mrb[57].mxu0 }
 0x309   : > { %v2913_v11 = vadd.f32 %v1975_v49, %v1587_v54  ;;  %v2288_v4 = vpop.f32.mrb[58].mxu0 }
 0x30a   : > { %v2915_v12 = vadd.f32 %v2288_v4, %v1975_v49  ;;  %v1590_v24 = vpop.f32.mrb[59].mxu0  ;;  %v1657_v55 = vsel %vm1650_vm1, %v2911_v52, -inf }
 0x30b   : > { %v2919_v56 = vadd.f32 %v1975_v49, %v1590_v24  ;;  %1658 = vmax.xlane.f32.xlu1 %v1657_v55  ;;  %v1651_v59 = vsel %vm1650_vm1, %v2913_v11, -inf }
 0x30c   : > { %1652 = vmax.xlane.f32.xlu0 %v1651_v59  ;;  %v1660_v60 = vsel %vm1650_vm1, %v2915_v12, -inf }
 0x30d   : > { %v1654_v22 = vsel %vm1650_vm1, %v2919_v56, -inf }
 0x30f   : > { %1661 = vmax.xlane.f32.xlu1 %v1660_v60 }
 0x310   : > { %1655 = vmax.xlane.f32.xlu0 %v1654_v22 }
 0x311   : > { %v2291_v61 = vpop.f32.mrb[60].mxu0 }
 0x312   : > { %v2927_v62 = vadd.f32 %v2291_v61, %v1975_v49  ;;  %v1603_v23 = vpop.f32.mrb[61].mxu0 }
 0x313   : > { %v2292_v63 = vpop.f32.mrb[62].mxu0  ;;  %v2929_v0 = vadd.f32 %v1975_v49, %v1603_v23 }
 0x314   : > { %v2931_v1 = vadd.f32 %v2292_v63, %v1975_v49  ;;  %v1606_v2 = vpop.f32.mrb[63].mxu0  ;;  %v1669_v36 = vsel %vm1650_vm1, %v2927_v62, -inf }
 0x315   : > { %1670 = vmax.xlane.f32.xlu0 %v1669_v36  ;;  %v2935_v6 = vadd.f32 %v1975_v49, %v1606_v2  ;;  %v1663_v9 = vsel %vm1650_vm1, %v2929_v0, -inf }
 0x316   : > { %v1672_v8 = vsel %vm1650_vm1, %v2931_v1, -inf }
 0x317   : > { %1673 = vmax.xlane.f32.xlu1 %v1672_v8  ;;  %v1666_v10 = vsel %vm1650_vm1, %v2935_v6, -inf }
 0x319   : > { %1664 = vmax.xlane.f32.xlu0 %v1663_v9 }
 0x31b   : > { %1667 = vmax.xlane.f32.xlu1 %v1666_v10 }
 0x321   : > { %v2295_v13 = vpop.f32.mrb[64].mxu0 }
 0x322   : > { %v2943_v14 = vadd.f32 %v2295_v13, %v1975_v49  ;;  %v1619_v15 = vpop.f32.mrb[65].mxu0 }
 0x323   : > { %v2296_v16 = vpop.f32.mrb[66].mxu0  ;;  %v2945_v17 = vadd.f32 %v1975_v49, %v1619_v15 }
 0x324   : > { %v2947_v39 = vadd.f32 %v2296_v16, %v1975_v49  ;;  %v1622_v18 = vpop.f32.mrb[67].mxu0  ;;  %v1681_v19 = vsel %vm1650_vm1, %v2943_v14, -inf }
 0x325   : > { %1682 = vmax.xlane.f32.xlu0 %v1681_v19  ;;  %v2951_v51 = vadd.f32 %v1975_v49, %v1622_v18  ;;  %v1675_v40 = vsel %vm1650_vm1, %v2945_v17, -inf }
 0x326   : > { %v1684_v20 = vsel %vm1650_vm1, %v2947_v39, -inf }
 0x327   : > { %1685 = vmax.xlane.f32.xlu1 %v1684_v20  ;;  %v1678_v26 = vsel %vm1650_vm1, %v2951_v51, -inf }
 0x329   : > { %v2299_v53 = vpop.f32.mrb[68].mxu0  ;;  %1676 = vmax.xlane.f32.xlu0 %v1675_v40 }
 0x32a   : > { %v1635_v25 = vpop.f32.mrb[69].mxu0  ;;  %v2961_v30 = vadd.f32 %v2299_v53, %v1975_v49 }
 0x32b   : > { %v2959_v27 = vadd.f32 %v1975_v49, %v1635_v25  ;;  %v2300_v28 = vpop.f32.mrb[70].mxu0  ;;  %1679 = vmax.xlane.f32.xlu1 %v1678_v26 }
 0x32c   : > { %v1638_v29 = vpop.f32.mrb[71].mxu0  ;;  %v2967_v33 = vadd.f32 %v2300_v28, %v1975_v49  ;;  %v1693_v35 = vsel %vm1650_vm1, %v2961_v30, -inf }
 0x32d   : > { %v2963_v31 = vadd.f32 %v1975_v49, %v1638_v29  ;;  %v1687_v32 = vsel %vm1650_vm1, %v2959_v27, -inf }
 0x32e   : > { %1688 = vmax.xlane.f32.xlu0 %v1687_v32  ;;  %v1696_v37 = vsel %vm1650_vm1, %v2967_v33, -inf }
 0x32f   : > { %v1690_v34 = vsel %vm1650_vm1, %v2963_v31, -inf }
 0x330   : > { %1691 = vmax.xlane.f32.xlu1 %v1690_v34 }
 0x332   : > { %1694 = vmax.xlane.f32.xlu0 %v1693_v35 }
 0x334   : > { %1697 = vmax.xlane.f32.xlu1 %v1696_v37 }
 0x398   : > { %v1659_v57 = vpop.xlane.xlu1 %1658 }
 0x399   : > { %v1701_v5 = vsub.f32 %v2911_v52, %v1659_v57  ;;  %v1653_v38 = vpop.xlane.xlu0 %1652 }
 0x39a   : > { %v1699_v41 = vsub.f32 %v2913_v11, %v1653_v38 }
 0x39b   : > { %v1719_v58 = vmul.f32 1.442695, %v1701_v5 }
 0x39c   : > { %v1715_v42 = vmul.f32 1.442695, %v1699_v41  ;;  %v1662_v7 = vpop.xlane.xlu1 %1661 }
 0x39d   : > { %2391 = vpow2.f32 %v1719_v58  ;;  %v1702_v43 = vsub.f32 %v2915_v12, %v1662_v7  ;;  %v1656_v44 = vpop.xlane.xlu0 %1655 }
 0x39e   : > { %v1700_v45 = vsub.f32 %v2919_v56, %v1656_v44  ;;  %2393 = vpow2.f32 %v1715_v42 }
 0x39f   : > { %v1721_v46 = vmul.f32 1.442695, %v1702_v43 }
 0x3a0   : > { %v1717_v21 = vmul.f32 1.442695, %v1700_v45 }
 0x3a1   : > { %2395 = vpow2.f32 %v1721_v46 }
 0x3a2   : > { %v1671_v47 = vpop.xlane.xlu0 %1670  ;;  %2397 = vpow2.f32 %v1717_v21 }
 0x3a3   : > { %v1705_v48 = vsub.f32 %v2927_v62, %v1671_v47 }
 0x3a4   : > { %v1674_v3 = vpop.xlane.xlu1 %1673 }
 0x3a5   : > { %v1727_v49 = vmul.f32 1.442695, %v1705_v48  ;;  %v1706_v50 = vsub.f32 %v2931_v1, %v1674_v3 }
 0x3a6   : > { %v1665_v52 = vpop.xlane.xlu0 %1664 }
 0x3a7   : > { %v2981_v54 = vpop.eup %2391  ;;  %2399 = vpow2.f32 %v1727_v49  ;;  %v1729_v11 = vmul.f32 1.442695, %v1706_v50  ;;  %v1703_v4 = vsub.f32 %v2929_v0, %v1665_v52 }
 0x3a8   : > { %v1668_v12 = vpop.xlane.xlu1 %1667  ;;  %v1753_v24 = vsel %vm1650_vm1, %v2981_v54, 0.0  ;;  %v2986_v55 = vpop.eup %2393 }
 0x3a9   : > { %2401 = vpow2.f32 %v1729_v11  ;;  %v1723_v56 = vmul.f32 1.442695, %v1703_v4  ;;  %v1704_v59 = vsub.f32 %v2935_v6, %v1668_v12  ;;  %1754 = vadd.xlane.f32.xlu0 %v1753_v24  ;;  %v1747_v62 = vsel %vm1650_vm1, %v2986_v55, 0.0 }
 0x3ab   : > { %v2989_v60 = vpop.eup %2395  ;;  %2403 = vpow2.f32 %v1723_v56  ;;  %v1725_v22 = vmul.f32 1.442695, %v1704_v59 }
 0x3ac   : > { %v1756_v61 = vsel %vm1650_vm1, %v2989_v60, 0.0  ;;  %v2995_v23 = vpop.eup %2397 }
 0x3ad   : > { %2405 = vpow2.f32 %v1725_v22  ;;  %1757 = vadd.xlane.f32.xlu1 %v1756_v61  ;;  %1748 = vadd.xlane.f32.xlu0 %v1747_v62  ;;  %v1750_v63 = vsel %vm1650_vm1, %v2995_v23, 0.0 }
 0x3b1   : > { %v2999_v0 = vpop.eup %2399  ;;  %1751 = vadd.xlane.f32.xlu1 %v1750_v63 }
 0x3b2   : > { %v1765_v1 = vsel %vm1650_vm1, %v2999_v0, 0.0  ;;  %v1683_v36 = vpop.xlane.xlu0 %1682 }
 0x3b3   : > { %v3003_v2 = vpop.eup %2401  ;;  %1766 = vadd.xlane.f32.xlu0 %v1765_v1  ;;  %v1709_v6 = vsub.f32 %v2943_v14, %v1683_v36 }
 0x3b4   : > { %v1768_v8 = vsel %vm1650_vm1, %v3003_v2, 0.0  ;;  %v1686_v10 = vpop.xlane.xlu1 %1685 }
 0x3b5   : > { %v3008_v9 = vpop.eup %2403  ;;  %1769 = vadd.xlane.f32.xlu1 %v1768_v8  ;;  %v1735_v13 = vmul.f32 1.442695, %v1709_v6  ;;  %v1710_v15 = vsub.f32 %v2947_v39, %v1686_v10 }
 0x3b6   : > { %v1759_v16 = vsel %vm1650_vm1, %v3008_v9, 0.0  ;;  %v1677_v19 = vpop.xlane.xlu0 %1676 }
 0x3b7   : > { %v3013_v18 = vpop.eup %2405  ;;  %1760 = vadd.xlane.f32.xlu0 %v1759_v16  ;;  %2407 = vpow2.f32 %v1735_v13  ;;  %v1737_v20 = vmul.f32 1.442695, %v1710_v15  ;;  %v1707_v14 = vsub.f32 %v2945_v17, %v1677_v19 }
 0x3b8   : > { %v1762_v40 = vsel %vm1650_vm1, %v3013_v18, 0.0  ;;  %v1680_v53 = vpop.xlane.xlu1 %1679 }
 0x3b9   : > { %1763 = vadd.xlane.f32.xlu1 %v1762_v40  ;;  %2409 = vpow2.f32 %v1737_v20  ;;  %v1731_v25 = vmul.f32 1.442695, %v1707_v14  ;;  %v1708_v39 = vsub.f32 %v2951_v51, %v1680_v53 }
 0x3bb   : > { %2411 = vpow2.f32 %v1731_v25  ;;  %v1733_v26 = vmul.f32 1.442695, %v1708_v39  ;;  %v1689_v28 = vpop.xlane.xlu0 %1688 }
 0x3bc   : > { %v1711_v29 = vsub.f32 %v2959_v27, %v1689_v28 }
 0x3bd   : > { %2413 = vpow2.f32 %v1733_v26  ;;  %v1692_v32 = vpop.xlane.xlu1 %1691 }
 0x3be   : > { %v1739_v34 = vmul.f32 1.442695, %v1711_v29  ;;  %v1712_v35 = vsub.f32 %v2963_v31, %v1692_v32 }
 0x3bf   : > { %v1695_v17 = vpop.xlane.xlu0 %1694 }
 0x3c0   : > { %2415 = vpow2.f32 %v1739_v34  ;;  %v1741_v37 = vmul.f32 1.442695, %v1712_v35  ;;  %v1713_v57 = vsub.f32 %v2961_v30, %v1695_v17 }
 0x3c1   : > { %v3022_v5 = vpop.eup %2407  ;;  %v1698_v38 = vpop.xlane.xlu1 %1697 }
 0x3c2   : > { %2417 = vpow2.f32 %v1741_v37  ;;  %v1743_v51 = vmul.f32 1.442695, %v1713_v57  ;;  %v1714_v41 = vsub.f32 %v2967_v33, %v1698_v38  ;;  %v1777_v27 = vsel %vm1650_vm1, %v3022_v5, 0.0 }
 0x3c3   : > { %v3027_v58 = vpop.eup %2409  ;;  %1778 = vadd.xlane.f32.xlu0 %v1777_v27 }
 0x3c4   : > { %2419 = vpow2.f32 %v1743_v51  ;;  %v1745_v31 = vmul.f32 1.442695, %v1714_v41  ;;  %v1780_v42 = vsel %vm1650_vm1, %v3027_v58, 0.0 }
 0x3c5   : > { %v3031_v7 = vpop.eup %2411  ;;  %1781 = vadd.xlane.f32.xlu1 %v1780_v42 }
 0x3c6   : > { %2421 = vpow2.f32 %v1745_v31  ;;  %v1771_v30 = vsel %vm1650_vm1, %v3031_v7, 0.0 }
 0x3c7   : > { %v3035_v43 = vpop.eup %2413  ;;  %1772 = vadd.xlane.f32.xlu0 %v1771_v30 }
 0x3c8   : > { %v1774_v33 = vsel %vm1650_vm1, %v3035_v43, 0.0 }
 0x3c9   : > { %1775 = vadd.xlane.f32.xlu1 %v1774_v33 }
 0x3ca   : > { %v3039_v44 = vpop.eup %2415 }
 0x3cb   : > { %v1783_v45 = vsel %vm1650_vm1, %v3039_v44, 0.0 }
 0x3cc   : > { %v3043_v46 = vpop.eup %2417  ;;  %1784 = vadd.xlane.f32.xlu0 %v1783_v45 }
 0x3cd   : > { %v1786_v21 = vsel %vm1650_vm1, %v3043_v46, 0.0 }
 0x3ce   : > { %v3047_v47 = vpop.eup %2419  ;;  %1787 = vadd.xlane.f32.xlu1 %v1786_v21 }
 0x3cf   : > { %v1789_v48 = vsel %vm1650_vm1, %v3047_v47, 0.0 }
 0x3d0   : > { %v3051_v3 = vpop.eup %2421  ;;  %1790 = vadd.xlane.f32.xlu0 %v1789_v48 }
 0x3d1   : > { %v1792_v49 = vsel %vm1650_vm1, %v3051_v3, 0.0 }
 0x3d2   : > { %1793 = vadd.xlane.f32.xlu1 %v1792_v49 }
 0x436   : > { %v1755_v50 = vpop.xlane.xlu0 %1754 }
 0x437   : > { %2423 = vrcp.f32 %v1755_v50 }
 0x43a   : > { %v1758_v52 = vpop.xlane.xlu1 %1757  ;;  %v1749_v11 = vpop.xlane.xlu0 %1748 }
 0x43b   : > { %2425 = vrcp.f32 %v1758_v52 }
 0x43c   : > { %2427 = vrcp.f32 %v1749_v11 }
 0x43e   : > { %v1752_v4 = vpop.xlane.xlu1 %1751 }
 0x43f   : > { %2429 = vrcp.f32 %v1752_v4 }
 0x440   : > { %v1767_v12 = vpop.xlane.xlu0 %1766 }
 0x441   : > { %v2424_v24 = vpop.eup %2423  ;;  %2431 = vrcp.f32 %v1767_v12 }
 0x442   : > { %v1800_v56 = vmul.f32 %v2424_v24, %v2981_v54  ;;  %v1770_v59 = vpop.xlane.xlu1 %1769 }
 0x443   : > { %2433 = vrcp.f32 %v1770_v59 }
 0x444   : > { %1829 = vst.msk [vmem:[%s3059_s21 + $0x10] sm:$0xff] %vm1650_vm1, %v1800_v56  ;;  %v1761_v22 = vpop.xlane.xlu0 %1760 }
 0x445   : > { %v2426_v61 = vpop.eup %2425  ;;  %2435 = vrcp.f32 %v1761_v22 }
 0x446   : > { %v2428_v62 = vpop.eup %2427  ;;  %v1802_v63 = vmul.f32 %v2426_v61, %v2989_v60  ;;  %v1764_v1 = vpop.xlane.xlu1 %1763 }
 0x447   : > { %v1796_v36 = vmul.f32 %v2428_v62, %v2986_v55  ;;  %2437 = vrcp.f32 %v1764_v1 }
 0x448   : > { %1830 = vst.msk [vmem:[%s3059_s21 + $0x18] sm:$0xff] %vm1650_vm1, %v1802_v63 }
 0x449   : > { %v2430_v54 = vpop.eup %2429  ;;  %1827 = vst.msk [vmem:[%s3059_s21] sm:$0xff] %vm1650_vm1, %v1796_v36 }
 0x44a   : > { %v1798_v6 = vmul.f32 %v2430_v54, %v2995_v23 }
 0x44b   : > { %v2432_v8 = vpop.eup %2431 }
 0x44c   : > { %1828 = vst.msk [vmem:[%s3059_s21 + $0x8] sm:$0xff] %vm1650_vm1, %v1798_v6  ;;  %v1808_v10 = vmul.f32 %v2432_v8, %v2999_v0 }
 0x44d   : > { %v2434_v13 = vpop.eup %2433 }
 0x44e   : > { %1833 = vst.msk [vmem:[%s3059_s21 + $0x30] sm:$0xff] %vm1650_vm1, %v1808_v10  ;;  %v1810_v55 = vmul.f32 %v2434_v13, %v3003_v2 }
 0x44f   : > { %v2436_v60 = vpop.eup %2435 }
 0x450   : > { %1834 = vst.msk [vmem:[%s3059_s21 + $0x38] sm:$0xff] %vm1650_vm1, %v1810_v55  ;;  %v1804_v15 = vmul.f32 %v2436_v60, %v3008_v9  ;;  %v1779_v19 = vpop.xlane.xlu0 %1778 }
 0x451   : > { %v2438_v16 = vpop.eup %2437  ;;  %2439 = vrcp.f32 %v1779_v19 }
 0x452   : > { %1831 = vst.msk [vmem:[%s3059_s21 + $0x20] sm:$0xff] %vm1650_vm1, %v1804_v15  ;;  %v1806_v23 = vmul.f32 %v2438_v16, %v3013_v18  ;;  %v1782_v20 = vpop.xlane.xlu1 %1781 }
 0x453   : > { %2441 = vrcp.f32 %v1782_v20 }
 0x454   : > { %1832 = vst.msk [vmem:[%s3059_s21 + $0x28] sm:$0xff] %vm1650_vm1, %v1806_v23  ;;  %v1773_v0 = vpop.xlane.xlu0 %1772 }
 0x455   : > { %2443 = vrcp.f32 %v1773_v0 }
 0x456   : > { %v1776_v2 = vpop.xlane.xlu1 %1775 }
 0x457   : > { %2445 = vrcp.f32 %v1776_v2 }
 0x459   : > { %v1785_v14 = vpop.xlane.xlu0 %1784 }
 0x45a   : > { %2447 = vrcp.f32 %v1785_v14 }
 0x45b   : > { %v2440_v9 = vpop.eup %2439  ;;  %v1788_v40 = vpop.xlane.xlu1 %1787 }
 0x45c   : > { %v1816_v53 = vmul.f32 %v2440_v9, %v3022_v5  ;;  %2449 = vrcp.f32 %v1788_v40 }
 0x45d   : > { %v2442_v18 = vpop.eup %2441  ;;  %v1791_v25 = vpop.xlane.xlu0 %1790 }
 0x45e   : > { %1837 = vst.msk [vmem:[%s3059_s21 + $0x50] sm:$0xff] %vm1650_vm1, %v1816_v53  ;;  %v1818_v39 = vmul.f32 %v2442_v18, %v3027_v58  ;;  %2451 = vrcp.f32 %v1791_v25 }
 0x45f   : > { %v2444_v26 = vpop.eup %2443  ;;  %v1794_v28 = vpop.xlane.xlu1 %1793 }
 0x460   : > { %1838 = vst.msk [vmem:[%s3059_s21 + $0x58] sm:$0xff] %vm1650_vm1, %v1818_v39  ;;  %v1812_v29 = vmul.f32 %v2444_v26, %v3031_v7  ;;  %2453 = vrcp.f32 %v1794_v28 }
 0x461   : > { %v2446_v32 = vpop.eup %2445 }
 0x462   : > { %1835 = vst.msk [vmem:[%s3059_s21 + $0x40] sm:$0xff] %vm1650_vm1, %v1812_v29  ;;  %v1814_v34 = vmul.f32 %v2446_v32, %v3035_v43 }
 0x464   : > { %v2448_v35 = vpop.eup %2447  ;;  %1836 = vst.msk [vmem:[%s3059_s21 + $0x48] sm:$0xff] %vm1650_vm1, %v1814_v34 }
 0x465   : > { %v1820_v17 = vmul.f32 %v2448_v35, %v3039_v44 }
 0x466   : > { %v2450_v37 = vpop.eup %2449 }
 0x467   : > { %1839 = vst.msk [vmem:[%s3059_s21 + $0x60] sm:$0xff] %vm1650_vm1, %v1820_v17  ;;  %v1822_v57 = vmul.f32 %v2450_v37, %v3043_v46 }
 0x468   : > { %v2452_v5 = vpop.eup %2451 }
 0x469   : > { %1840 = vst.msk [vmem:[%s3059_s21 + $0x68] sm:$0xff] %vm1650_vm1, %v1822_v57  ;;  %v1824_v38 = vmul.f32 %v2452_v5, %v3047_v47 }
 0x46a   : > { %v2454_v51 = vpop.eup %2453 }
 0x46b   : > { %1841 = vst.msk [vmem:[%s3059_s21 + $0x70] sm:$0xff] %vm1650_vm1, %v1824_v38  ;;  %v1826_v41 = vmul.f32 %v2454_v51, %v3051_v3 }
 0x46d   : > { %1842 = vst.msk [vmem:[%s3059_s21 + $0x78] sm:$0xff] %vm1650_vm1, %v1826_v41 }
 0x46e PF: > { %s17_s24 = sadd.s32 1, %s2461_s24  }
 0x46f   : > { %p14_p4 = scmp.ge.s32.totalorder %s17_s24, 6  }
 0x471   :  { %16 = sbr.rel (!%p14_p4) target bundleno = 1 (0x1), region = 78 }

</bundles_post_ra>
